<compile_context>
chip_gen: v6e
topology: v6e:2x2x1
jax: 0.10.0
libtpu: 0.0.40
codegen_flags: <defaults>
</compile_context>

<pallas_src>
import functools

import jax
import jax.numpy as jnp
from jax.experimental import pallas as pl
from jax.experimental.pallas import tpu as pltpu

LANE = 128  # TPU lane width


def _round_up(a, b):
    return (a + b - 1) // b * b


def _choose_tiles(n):
    """Node padding and (row, reduction) tile sizes.

    np_ is padded to a multiple of 128 so the A tile is always lane-dense.
    tm is chosen so there are >=2 row steps whenever possible (v7x megacore);
    tk is the largest of {1024, 512, 256, 128} dividing np_ (bounds VMEM,
    amortizes per-step overhead).
    """
    np_ = _round_up(max(n, 128), 128)
    if np_ % 512 == 0 and np_ >= 1024:
        tm = 512
    elif np_ % 256 == 0 and np_ >= 512:
        tm = 256
    else:
        tm = 128
    tk = 128
    for cand in (1024, 512, 256):
        if np_ % cand == 0:
            tk = cand
            break
    return np_, tm, tk


# ---------------------------------------------------------------------------
# Kernel
# ---------------------------------------------------------------------------
def stgraph_tgcn_kernel(a_ref, xs_ref, hs_ref, w_ref, b_ref, out_ref, acc_ref,
                        *, lane):
    """Grid = (row blocks i : parallel, K blocks k : arbitrary).

    a_ref   : [tm, tk]        A_hat tile (stream dtype, bf16 by default)
    xs_ref  : [tk, lane]      X slab K-block  (lanes 0:F = X, rest 0)
    hs_ref  : [tm, lane]      H slab row block (f32, lanes 0:U = H, rest 0)
    w_ref   : [5*lane, 3*lane] packed f32 weights (see pack_params)
    b_ref   : [8, 3*lane]     packed f32 biases
    out_ref : [tm, lane]      packed output [h_new | y | y_out] disjoint lanes
    acc_ref : [tm, lane]      f32 scratch accumulator for A @ X
    """
    k = pl.program_id(1)

    @pl.when(k == 0)
    def _init():
        acc_ref[...] = jnp.zeros_like(acc_ref)

    # Dominant work: stream one A tile + one X-slab tile, accumulate in f32.
    acc_ref[...] += jnp.dot(a_ref[...], xs_ref[...],
                            preferred_element_type=jnp.float32)

    @pl.when(k == pl.num_programs(1) - 1)
    def _finalize():
        ax = acc_ref[...]          # [tm, lane]  f32  (A @ X in lanes 0:F)
        h = hs_ref[...]            # [tm, lane]  f32  (H in lanes 0:U, pad = 0)

        w_cx = w_ref[0:lane, :]                       # conv->gate (folded)
        w_h = w_ref[lane:2 * lane, :]                 # hidden->gate
        w_ch = w_ref[2 * lane:3 * lane, 0:lane]       # Wlch
        w_1 = w_ref[3 * lane:4 * lane, 0:lane]        # head 1 (shifted lanes)
        w_2 = w_ref[4 * lane:5 * lane, 0:lane]        # head 2 (shifted lanes)
        b = b_ref[...]

        # Fused gate pre-activations: one 128-lane block per gate (z | r | c).
        pre = (jnp.dot(ax, w_cx, preferred_element_type=jnp.float32)
               + jnp.dot(h, w_h, preferred_element_type=jnp.float32)
               + b[0:1, :])
        z = jax.nn.sigmoid(pre[:, 0:lane])
        r = jax.nn.sigmoid(pre[:, lane:2 * lane])
        ch = jnp.dot(h * r, w_ch, preferred_element_type=jnp.float32)
        h_tilde = jnp.tanh(pre[:, 2 * lane:3 * lane] + ch)
        h_new = z * h + (1.0 - z) * h_tilde           # pad lanes stay exactly 0

        # Output heads produce results pre-shifted into disjoint lane ranges,
        # so one add packs [h_new | y | y_out] into a single 128-lane block.
        y_w = jnp.dot(jnp.maximum(h_new, 0.0), w_1,
                      preferred_element_type=jnp.float32) + b[1:2, 0:lane]
        yo_w = jnp.dot(y_w, w_2,
                       preferred_element_type=jnp.float32) + b[2:3, 0:lane]
        out_ref[...] = h_new + y_w + yo_w


# ---------------------------------------------------------------------------
# Wrapper-side packing (plain JAX glue, done ONCE per model, not per step)
# ---------------------------------------------------------------------------
def pack_params(a_hat, params, *, stream_dtype=jnp.bfloat16):
    n = a_hat.shape[0]
    f, u = params["wz"].shape
    o = params["w2"].shape[1]
    # Packed single-block layouts need U, F and U+F+O to fit in 128 lanes.
    assert u <= LANE and f <= LANE and u + f + o <= LANE, (
        "packed layout assumes U <= 128, F <= 128 and U+F+O <= 128")

    np_, tm, tk = _choose_tiles(n)

    # Padded, lane-dense adjacency in the streaming dtype (bf16 halves HBM
    # traffic of the dominant operand; accumulation stays f32 in-kernel).
    a_p = jnp.zeros((np_, np_), stream_dtype)
    a_p = a_p.at[:n, :n].set(a_hat.astype(stream_dtype))

    # Packed f32 weight slab, width 3*LANE (one 128-lane block per gate).
    w = jnp.zeros((5 * LANE, 3 * LANE), jnp.float32)
    # conv -> gate path, weights folded:  (A@X) @ (Wg @ Wlgx)
    w = w.at[0:f, 0 * LANE:0 * LANE + u].set(params["wz"] @ params["wlzx"])
    w = w.at[0:f, 1 * LANE:1 * LANE + u].set(params["wr"] @ params["wlrx"])
    w = w.at[0:f, 2 * LANE:2 * LANE + u].set(params["wc"] @ params["wlcx"])
    # hidden -> gate path
    w = w.at[LANE:LANE + u, 0 * LANE:0 * LANE + u].set(params["wlzh"])
    w = w.at[LANE:LANE + u, 1 * LANE:1 * LANE + u].set(params["wlrh"])
    # candidate hidden weight and the two heads (heads pre-shifted into the
    # lane ranges they occupy in the single-block output).
    w = w.at[2 * LANE:2 * LANE + u, 0:u].set(params["wlch"])
    w = w.at[3 * LANE:3 * LANE + u, u:u + f].set(params["w1"])
    w = w.at[4 * LANE + u:4 * LANE + u + f, u + f:u + f + o].set(params["w2"])

    # Packed f32 biases (conv biases folded through the gate-x weights).
    b = jnp.zeros((8, 3 * LANE), jnp.float32)
    b = b.at[0, 0 * LANE:0 * LANE + u].set(
        (params["bz"] @ params["wlzx"] + params["blz"])[0])
    b = b.at[0, 1 * LANE:1 * LANE + u].set(
        (params["br"] @ params["wlrx"] + params["blr"])[0])
    b = b.at[0, 2 * LANE:2 * LANE + u].set(
        (params["bc"] @ params["wlcx"] + params["blc"])[0])
    b = b.at[1, u:u + f].set(params["b1"][0])
    b = b.at[2, u + f:u + f + o].set(params["b2"][0])

    return dict(a=a_p, w=w, b=b, n=n, np=np_, tm=tm, tk=tk,
                u=u, f=f, o=o, stream_dtype=stream_dtype)


def stgraph_tgcn_step(model, x, h):
    """One forward step: only the (small) per-timestep node slabs are packed."""
    n, np_, tm, tk = model["n"], model["np"], model["tm"], model["tk"]
    u, f, o = model["u"], model["f"], model["o"]
    sdt = model["stream_dtype"]

    # X slab is streamed over the K axis -> stream dtype; H slab stays f32 so
    # the recurrent hidden state never goes through a low-precision roundtrip.
    x_slab = jnp.zeros((np_, LANE), sdt).at[:n, 0:f].set(x.astype(sdt))
    h_slab = jnp.zeros((np_, LANE), jnp.float32).at[:n, 0:u].set(
        h.astype(jnp.float32))

    grid = (np_ // tm, np_ // tk)

    # Explicit VMEM budget (double-buffered inputs/outputs + scratch + weights),
    # capped well inside every generation's physical VMEM (v7x = 64 MiB).
    sb = jnp.dtype(sdt).itemsize
    vmem_bytes = (2 * (tm * tk * sb + tk * LANE * sb + tm * LANE * 4
                       + tm * LANE * 4)
                  + tm * LANE * 4 + model["w"].size * 4 + model["b"].size * 4)
    vmem_limit = int(min(max(2 * vmem_bytes, 16 * 1024 * 1024),
                         48 * 1024 * 1024))

    out = pl.pallas_call(
        functools.partial(stgraph_tgcn_kernel, lane=LANE),
        out_shape=jax.ShapeDtypeStruct((np_, LANE), jnp.float32),
        grid=grid,
        in_specs=[
            pl.BlockSpec((tm, tk), lambda i, k: (i, k)),          # A tile
            pl.BlockSpec((tk, LANE), lambda i, k: (k, 0)),        # X slab (K)
            pl.BlockSpec((tm, LANE), lambda i, k: (i, 0)),        # H slab (row)
            pl.BlockSpec((5 * LANE, 3 * LANE), lambda i, k: (0, 0)),  # weights
            pl.BlockSpec((8, 3 * LANE), lambda i, k: (0, 0)),         # biases
        ],
        out_specs=pl.BlockSpec((tm, LANE), lambda i, k: (i, 0)),
        scratch_shapes=[pltpu.VMEM((tm, LANE), jnp.float32)],
        compiler_params=pltpu.CompilerParams(
            dimension_semantics=("parallel", "arbitrary"),
            vmem_limit_bytes=vmem_limit),
    )(model["a"], x_slab, h_slab, model["w"], model["b"])

    # NOTE: padded rows n..np_ carry bias-only garbage; always slice [:n] and
    # never feed the padded slab back as the next-step hidden state.
    h_new = out[:n, 0:u]
    y = out[:n, u:u + f]
    y_out = out[:n, u + f:u + f + o]
    return y_out, y, h_new


def stgraph_tgcn_forward(a_hat, x, h, params, *, stream_dtype=jnp.bfloat16):
    """Convenience wrapper: pack (once) + one step."""
    model = pack_params(a_hat, params, stream_dtype=stream_dtype)
    return stgraph_tgcn_step(model, x, h)


# ---------------------------------------------------------------------------
# Graph / parameter helpers and pure-JAX reference
# ---------------------------------------------------------------------------
def build_normalized_adjacency(w_adj):
    """A_hat = D^{-1/2} (W + I) D^{-1/2} with self loops (plain JAX glue)."""
    n = w_adj.shape[0]
    a = w_adj + jnp.eye(n, dtype=w_adj.dtype)
    deg = jnp.sum(a, axis=1)
    d_inv_sqrt = jnp.where(deg > 0, 1.0 / jnp.sqrt(deg), 0.0)
    return a * d_inv_sqrt[:, None] * d_inv_sqrt[None, :]


def init_params(key, node_features, num_hidden_units, out_features):
    f, u, o = node_features, num_hidden_units, out_features
    ks = jax.random.split(key, 16)
    s = 0.1

    def w(k, shape):
        return (s * jax.random.normal(k, shape)).astype(jnp.float32)

    params = {
        "wz": w(ks[0], (f, u)), "bz": w(ks[1], (1, u)),
        "wr": w(ks[2], (f, u)), "br": w(ks[3], (1, u)),
        "wc": w(ks[4], (f, u)), "bc": w(ks[5], (1, u)),
        "wlzx": w(ks[6], (u, u)), "wlzh": w(ks[7], (u, u)), "blz": w(ks[8], (1, u)),
        "wlrx": w(ks[9], (u, u)), "wlrh": w(ks[10], (u, u)), "blr": w(ks[11], (1, u)),
        "wlcx": w(ks[12], (u, u)), "wlch": w(ks[13], (u, u)), "blc": w(ks[14], (1, u)),
    }
    k1, k2, k3, k4 = jax.random.split(ks[15], 4)
    params["w1"] = w(k1, (u, f))
    params["b1"] = w(k2, (1, f))
    params["w2"] = w(k3, (f, o))
    params["b2"] = w(k4, (1, o))
    return params


def reference_forward(a_hat, x, h, params):
    """Unfused pure-JAX reference of the same forward pass."""
    hp = jax.lax.Precision.HIGHEST

    def mm(a, b):
        return jnp.dot(a, b, precision=hp)

    cz = mm(a_hat, mm(x, params["wz"])) + params["bz"]
    z = jax.nn.sigmoid(mm(cz, params["wlzx"]) + mm(h, params["wlzh"]) + params["blz"])
    cr = mm(a_hat, mm(x, params["wr"])) + params["br"]
    r = jax.nn.sigmoid(mm(cr, params["wlrx"]) + mm(h, params["wlrh"]) + params["blr"])
    cc = mm(a_hat, mm(x, params["wc"])) + params["bc"]
    h_tilde = jnp.tanh(mm(cc, params["wlcx"]) + mm(h * r, params["wlch"]) + params["blc"])
    h_new = z * h + (1.0 - z) * h_tilde
    y = mm(jnp.maximum(h_new, 0.0), params["w1"]) + params["b1"]
    y_out = mm(y, params["w2"]) + params["b2"]
    return y_out, y, h_new


if __name__ == "__main__":
    N = 16   # nodes
    F = 4    # node_features
    U = 32   # num_hidden_units
    O = 2    # out_features

    key = jax.random.PRNGKey(0)
    k_feat, k_hid, k_adj, k_par = jax.random.split(key, 4)

    node_feat = jax.random.normal(k_feat, (N, F), dtype=jnp.float32)
    hidden_state = jax.random.normal(k_hid, (N, U), dtype=jnp.float32)

    # Synthetic dense weighted undirected graph -> normalized adjacency.
    raw = jax.random.uniform(k_adj, (N, N), dtype=jnp.float32)
    w_adj = jnp.where(raw > 0.7, raw, 0.0)
    w_adj = 0.5 * (w_adj + w_adj.T)
    w_adj = w_adj * (1.0 - jnp.eye(N, dtype=jnp.float32))
    a_hat = build_normalized_adjacency(w_adj)

    params = init_params(k_par, F, U, O)
    y_out_r, y_r, h_r = reference_forward(a_hat, node_feat, hidden_state, params)

    # f32-streaming path (reference numerics).
    y_out, y, h_new = stgraph_tgcn_forward(a_hat, node_feat, hidden_state, params,
                                           stream_dtype=jnp.float32)
    jax.block_until_ready((y_out, y, h_new))
    assert y_out.shape == (N, O) and y.shape == (N, F) and h_new.shape == (N, U)
    assert jnp.allclose(h_new, h_r, atol=1e-3, rtol=1e-3)
    assert jnp.allclose(y, y_r, atol=1e-3, rtol=1e-3)
    assert jnp.allclose(y_out, y_out_r, atol=1e-3, rtol=1e-3)

    # Default bf16-streaming path (A_hat / X in bf16, f32 accumulation & gates).
    y_out_b, y_b, h_b = stgraph_tgcn_forward(a_hat, node_feat, hidden_state, params)
    jax.block_until_ready((y_out_b, y_b, h_b))
    assert jnp.allclose(h_b, h_r, atol=3e-2, rtol=3e-2)
    assert jnp.allclose(y_b, y_r, atol=3e-2, rtol=3e-2)
    assert jnp.allclose(y_out_b, y_out_r, atol=3e-2, rtol=3e-2)

    print("KERNEL_OK")
</pallas_src>

<mosaic_0001>
module attributes {stable_mosaic.version = 11 : i64} {
  func.func @stgraph_tgcn_kernel(%arg0: i32, %arg1: i32, %arg2: memref<128x128xf32, #tpu.memory_space<vmem>>, %arg3: memref<128x128xf32, #tpu.memory_space<vmem>>, %arg4: memref<128x128xf32, #tpu.memory_space<vmem>>, %arg5: memref<640x384xf32, #tpu.memory_space<vmem>>, %arg6: memref<8x384xf32, #tpu.memory_space<vmem>>, %arg7: memref<128x128xf32, #tpu.memory_space<vmem>>, %arg8: memref<128x128xf32, #tpu.memory_space<vmem>>) attributes {dimension_semantics = [#tpu.dimension_semantics<parallel>, #tpu.dimension_semantics<arbitrary>], iteration_bounds = array<i64: 1, 1>, scalar_prefetch = 0 : i64, scratch_operands = 1 : i64, tpu.core_type = #tpu.core_type<tc>, window_params = [{transform_indices = @transform_0, window_bounds = array<i64: 128, 128>}, {transform_indices = @transform_1, window_bounds = array<i64: 128, 128>}, {transform_indices = @transform_2, window_bounds = array<i64: 128, 128>}, {pipeline_mode = #tpu.pipeline_mode<synchronous>, transform_indices = @transform_3, window_bounds = array<i64: 640, 384>}, {pipeline_mode = #tpu.pipeline_mode<synchronous>, transform_indices = @transform_4, window_bounds = array<i64: 8, 384>}, {transform_indices = @transform_5, window_bounds = array<i64: 128, 128>}]} {
    %c0_i32 = arith.constant 0 : i32
    %0 = arith.cmpi eq, %arg1, %c0_i32 : i32
    %1 = arith.extui %0 : i1 to i32
    %c0_i32_0 = arith.constant 0 : i32
    %2 = arith.cmpi ne, %1, %c0_i32_0 : i32
    scf.if %2 {
      %cst_10 = arith.constant 0.000000e+00 : f32
      %12 = vector.broadcast %cst_10 : f32 to vector<128x128xf32>
      %c0_11 = arith.constant 0 : index
      %c0_12 = arith.constant 0 : index
      %13 = vector.load %arg8[%c0_11, %c0_12] : memref<128x128xf32, #tpu.memory_space<vmem>>, vector<128x128xf32>
      tpu.vector_store %arg8[%c0_11, %c0_12], %12 {strides = array<i32>} : memref<128x128xf32, #tpu.memory_space<vmem>>, vector<128x128xf32>,
    } else {
    }
    %c0 = arith.constant 0 : index
    %c0_1 = arith.constant 0 : index
    %3 = vector.load %arg8[%c0, %c0_1] : memref<128x128xf32, #tpu.memory_space<vmem>>, vector<128x128xf32>
    %c0_2 = arith.constant 0 : index
    %c0_3 = arith.constant 0 : index
    %4 = vector.load %arg2[%c0_2, %c0_3] : memref<128x128xf32, #tpu.memory_space<vmem>>, vector<128x128xf32>
    %c0_4 = arith.constant 0 : index
    %c0_5 = arith.constant 0 : index
    %5 = vector.load %arg3[%c0_4, %c0_5] : memref<128x128xf32, #tpu.memory_space<vmem>>, vector<128x128xf32>
    %cst = arith.constant dense<0.000000e+00> : vector<128x128xf32>
    %6 = tpu.matmul %4, %5, %cst {dimension_numbers = #tpu.dot_dimension_numbers<[1], [0], [0], [1], [0, 0, 1, 1], [], []>} : vector<128x128xf32>, vector<128x128xf32>, vector<128x128xf32> -> vector<128x128xf32>
    %7 = arith.addf %3, %6 : vector<128x128xf32>
    %c0_6 = arith.constant 0 : index
    %c0_7 = arith.constant 0 : index
    %8 = vector.load %arg8[%c0_6, %c0_7] : memref<128x128xf32, #tpu.memory_space<vmem>>, vector<128x128xf32>
    tpu.vector_store %arg8[%c0_6, %c0_7], %7 {strides = array<i32>} : memref<128x128xf32, #tpu.memory_space<vmem>>, vector<128x128xf32>,
    %c0_i32_8 = arith.constant 0 : i32
    %9 = arith.cmpi eq, %arg1, %c0_i32_8 : i32
    %10 = arith.extui %9 : i1 to i32
    %c0_i32_9 = arith.constant 0 : i32
    %11 = arith.cmpi ne, %10, %c0_i32_9 : i32
    scf.if %11 {
      %c0_10 = arith.constant 0 : index
      %c0_11 = arith.constant 0 : index
      %12 = vector.load %arg8[%c0_10, %c0_11] : memref<128x128xf32, #tpu.memory_space<vmem>>, vector<128x128xf32>
      %c0_12 = arith.constant 0 : index
      %c0_13 = arith.constant 0 : index
      %13 = vector.load %arg4[%c0_12, %c0_13] : memref<128x128xf32, #tpu.memory_space<vmem>>, vector<128x128xf32>
      %c0_14 = arith.constant 0 : index
      %c0_15 = arith.constant 0 : index
      %14 = vector.load %arg5[%c0_14, %c0_15] : memref<640x384xf32, #tpu.memory_space<vmem>>, vector<128x384xf32>
      %c128 = arith.constant 128 : index
      %c0_16 = arith.constant 0 : index
      %15 = vector.load %arg5[%c128, %c0_16] : memref<640x384xf32, #tpu.memory_space<vmem>>, vector<128x384xf32>
      %c256 = arith.constant 256 : index
      %c0_17 = arith.constant 0 : index
      %16 = vector.load %arg5[%c256, %c0_17] : memref<640x384xf32, #tpu.memory_space<vmem>>, vector<128x128xf32>
      %c384 = arith.constant 384 : index
      %c0_18 = arith.constant 0 : index
      %17 = vector.load %arg5[%c384, %c0_18] : memref<640x384xf32, #tpu.memory_space<vmem>>, vector<128x128xf32>
      %c512 = arith.constant 512 : index
      %c0_19 = arith.constant 0 : index
      %18 = vector.load %arg5[%c512, %c0_19] : memref<640x384xf32, #tpu.memory_space<vmem>>, vector<128x128xf32>
      %c0_20 = arith.constant 0 : index
      %c0_21 = arith.constant 0 : index
      %19 = vector.load %arg6[%c0_20, %c0_21] : memref<8x384xf32, #tpu.memory_space<vmem>>, vector<8x384xf32>
      %cst_22 = arith.constant dense<0.000000e+00> : vector<128x384xf32>
      %20 = tpu.matmul %12, %14, %cst_22 {dimension_numbers = #tpu.dot_dimension_numbers<[1], [0], [0], [1], [0, 0, 1, 1], [], []>} : vector<128x128xf32>, vector<128x384xf32>, vector<128x384xf32> -> vector<128x384xf32>
      %cst_23 = arith.constant dense<0.000000e+00> : vector<128x384xf32>
      %21 = tpu.matmul %13, %15, %cst_23 {dimension_numbers = #tpu.dot_dimension_numbers<[1], [0], [0], [1], [0, 0, 1, 1], [], []>} : vector<128x128xf32>, vector<128x384xf32>, vector<128x384xf32> -> vector<128x384xf32>
      %22 = arith.addf %20, %21 : vector<128x384xf32>
      %23 = vector.extract_strided_slice %19 {offsets = [0, 0], sizes = [1, 384], strides = [1, 1]} : vector<8x384xf32> to vector<1x384xf32>
      %24 = vector.broadcast %23 : vector<1x384xf32> to vector<128x384xf32>
      %25 = arith.addf %22, %24 : vector<128x384xf32>
      %26 = vector.extract_strided_slice %25 {offsets = [0, 0], sizes = [128, 128], strides = [1, 1]} : vector<128x384xf32> to vector<128x128xf32>
      %27 = arith.negf %26 : vector<128x128xf32>
      %28 = math.exp %27 : vector<128x128xf32>
      %cst_24 = arith.constant 1.000000e+00 : f32
      %29 = vector.broadcast %cst_24 : f32 to vector<128x128xf32>
      %30 = arith.addf %29, %28 : vector<128x128xf32>
      %31 = arith.divf %29, %30 : vector<128x128xf32>
      %32 = vector.extract_strided_slice %25 {offsets = [0, 128], sizes = [128, 128], strides = [1, 1]} : vector<128x384xf32> to vector<128x128xf32>
      %33 = arith.negf %32 : vector<128x128xf32>
      %34 = math.exp %33 : vector<128x128xf32>
      %cst_25 = arith.constant 1.000000e+00 : f32
      %35 = vector.broadcast %cst_25 : f32 to vector<128x128xf32>
      %36 = arith.addf %35, %34 : vector<128x128xf32>
      %37 = arith.divf %35, %36 : vector<128x128xf32>
      %38 = arith.mulf %13, %37 : vector<128x128xf32>
      %cst_26 = arith.constant dense<0.000000e+00> : vector<128x128xf32>
      %39 = tpu.matmul %38, %16, %cst_26 {dimension_numbers = #tpu.dot_dimension_numbers<[1], [0], [0], [1], [0, 0, 1, 1], [], []>} : vector<128x128xf32>, vector<128x128xf32>, vector<128x128xf32> -> vector<128x128xf32>
      %40 = vector.extract_strided_slice %25 {offsets = [0, 256], sizes = [128, 128], strides = [1, 1]} : vector<128x384xf32> to vector<128x128xf32>
      %41 = arith.addf %40, %39 : vector<128x128xf32>
      %42 = math.tanh %41 : vector<128x128xf32>
      %43 = arith.mulf %31, %13 : vector<128x128xf32>
      %cst_27 = arith.constant 1.000000e+00 : f32
      %44 = vector.broadcast %cst_27 : f32 to vector<128x128xf32>
      %45 = arith.subf %44, %31 : vector<128x128xf32>
      %46 = arith.mulf %45, %42 : vector<128x128xf32>
      %47 = arith.addf %43, %46 : vector<128x128xf32>
      %cst_28 = arith.constant 0.000000e+00 : f32
      %48 = vector.broadcast %cst_28 : f32 to vector<128x128xf32>
      %49 = arith.maximumf %47, %48 : vector<128x128xf32>
      %cst_29 = arith.constant dense<0.000000e+00> : vector<128x128xf32>
      %50 = tpu.matmul %49, %17, %cst_29 {dimension_numbers = #tpu.dot_dimension_numbers<[1], [0], [0], [1], [0, 0, 1, 1], [], []>} : vector<128x128xf32>, vector<128x128xf32>, vector<128x128xf32> -> vector<128x128xf32>
      %51 = vector.extract_strided_slice %19 {offsets = [1, 0], sizes = [1, 128], strides = [1, 1]} : vector<8x384xf32> to vector<1x128xf32>
      %52 = vector.broadcast %51 : vector<1x128xf32> to vector<128x128xf32>
      %53 = arith.addf %50, %52 : vector<128x128xf32>
      %cst_30 = arith.constant dense<0.000000e+00> : vector<128x128xf32>
      %54 = tpu.matmul %53, %18, %cst_30 {dimension_numbers = #tpu.dot_dimension_numbers<[1], [0], [0], [1], [0, 0, 1, 1], [], []>} : vector<128x128xf32>, vector<128x128xf32>, vector<128x128xf32> -> vector<128x128xf32>
      %55 = vector.extract_strided_slice %19 {offsets = [2, 0], sizes = [1, 128], strides = [1, 1]} : vector<8x384xf32> to vector<1x128xf32>
      %56 = vector.broadcast %55 : vector<1x128xf32> to vector<128x128xf32>
      %57 = arith.addf %54, %56 : vector<128x128xf32>
      %58 = arith.addf %47, %53 : vector<128x128xf32>
      %59 = arith.addf %58, %57 : vector<128x128xf32>
      %c0_31 = arith.constant 0 : index
      %c0_32 = arith.constant 0 : index
      %60 = vector.load %arg7[%c0_31, %c0_32] : memref<128x128xf32, #tpu.memory_space<vmem>>, vector<128x128xf32>
      tpu.vector_store %arg7[%c0_31, %c0_32], %59 {strides = array<i32>} : memref<128x128xf32, #tpu.memory_space<vmem>>, vector<128x128xf32>,
    } else {
    }
    return
  }
  func.func @transform_0(%arg0: i32, %arg1: i32) -> (i32, i32) {
    %c0_i32 = arith.constant 0 : i32
    return %arg0, %arg1 : i32, i32
  }
  func.func @transform_1(%arg0: i32, %arg1: i32) -> (i32, i32) {
    %c0_i32 = arith.constant 0 : i32
    %c0_i32_0 = arith.constant 0 : i32
    return %arg1, %c0_i32 : i32, i32
  }
  func.func @transform_2(%arg0: i32, %arg1: i32) -> (i32, i32) {
    %c0_i32 = arith.constant 0 : i32
    %c0_i32_0 = arith.constant 0 : i32
    return %arg0, %c0_i32 : i32, i32
  }
  func.func @transform_3(%arg0: i32, %arg1: i32) -> (i32, i32) {
    %c0_i32 = arith.constant 0 : i32
    %c0_i32_0 = arith.constant 0 : i32
    %c0_i32_1 = arith.constant 0 : i32
    return %c0_i32, %c0_i32_0 : i32, i32
  }
  func.func @transform_4(%arg0: i32, %arg1: i32) -> (i32, i32) {
    %c0_i32 = arith.constant 0 : i32
    %c0_i32_0 = arith.constant 0 : i32
    %c0_i32_1 = arith.constant 0 : i32
    return %c0_i32, %c0_i32_0 : i32, i32
  }
  func.func @transform_5(%arg0: i32, %arg1: i32) -> (i32, i32) {
    %c0_i32 = arith.constant 0 : i32
    %c0_i32_0 = arith.constant 0 : i32
    return %arg0, %c0_i32 : i32, i32
  }
}

</mosaic_0001>

<bundles_post_ra>
// kernel: tpu_custom_call.1
= control target key start
LH: loop header
LB: loop body
LE: loop exit
PB: predicated region body
PF: predicated region fallthrough
CT: control target
= control target key end

     0   :  { %10 = vsyncpa [#allocation4], 0  ;;  %s3507_s0 = inlined_call_operand.hbm [shape: f32[128,128], index: 0, kind: input, shape index: {}]   ;;  %s3508_s1 = inlined_call_operand.hbm [shape: f32[128,128], index: 1, kind: input, shape index: {}]   ;;  %s3509_s2 = inlined_call_operand.hbm [shape: f32[128,128], index: 2, kind: input, shape index: {}]   ;;  %s3510_s3 = inlined_call_operand.hbm [shape: f32[640,384], index: 3, kind: input, shape index: {}]   ;;  %s3511_s4 = inlined_call_operand.hbm [shape: f32[8,384], index: 4, kind: input, shape index: {}]   ;;  %s3512_s5 = inlined_call_operand.hbm [shape: f32[128,128], index: 5, kind: output, shape index: {}]  }
   0x1   :  { %11 = vsyncpa [#allocation7], 0 }
   0x2   :  { %12 = vsyncpa [#allocation10], 0 }
   0x3   :  { %13 = vsyncpa [#allocation5], 0  ;;  %s2892_s18 = smov [#allocation6]   ;;  %s2893_s20 = smov [#allocation9]  }
   0x4   :  { %s31_s19 = sshll.u32 %s2892_s18, 4  ;;  %s55_s21 = sshll.u32 %s2893_s20, 4  ;;  %s32_s19 = int_to_ptr.vmem [resolvable:$true] %s31_s19  ;;  %s56_s21 = int_to_ptr.vmem [resolvable:$true] %s55_s21 }
   0x5   :  { %s2772_s22 = scalar_lea.vmem %s32_s19, 2048  ;;  %p2777_p1 = scmp.lt.s32.totalorder %s32_s19, %s32_s19 }
   0x6   :  { %p2773_p0 = scmp.ne.s32.totalorder %s32_s19, %s2772_s22  ;;  %p2778_p2 = scmp.lt.s32.totalorder %s2772_s22, %s2772_s22 }
   0x8   :  { %p2779_p3 = por %p2778_p2, %p2777_p1 }
   0xa   :  { %p2780_p4 = pnand %p2779_p3, %p2773_p0 }
   0xc   :  { %2783 = shalt.err (!%p2780_p4)
}
   0xd   :  { %s2894_s23 = smov 128   ;;  %s2895_s24 = smov 8  }
   0xe   :  { %37 = dma.hbm_to_vmem [thread:$0]  %s3508_s1, 2048, %s32_s19, [#allocation7], %s2894_s23, %s2894_s23, %s2895_s24  }
   0xf   :  { %s2792_s27 = scalar_lea.vmem %s56_s21, 30720  ;;  %p2797_p6 = scmp.lt.s32.totalorder %s56_s21, %s56_s21 }
  0x10   :  { %p2793_p5 = scmp.ne.s32.totalorder %s56_s21, %s2792_s27  ;;  %p2798_p7 = scmp.lt.s32.totalorder %s2792_s27, %s2792_s27 }
  0x12   :  { %p2799_p8 = por %p2798_p7, %p2797_p6 }
  0x14   :  { %p2800_p9 = pnand %p2799_p8, %p2793_p5 }
  0x16   :  { %2803 = shalt.err (!%p2800_p9)
}
  0x17   :  { %s2896_s28 = smov 384   ;;  %s2897_s29 = smov 24  }
  0x18   :  { %61 = dma.hbm_to_vmem [thread:$0]  %s3510_s3, 30720, %s56_s21, [#allocation10], %s2896_s28, %s2896_s28, %s2897_s29  }
  0x19   :  { %s2898_s7 = smov [#allocation3]   ;;  %s2899_s9 = smov [#allocation8]  }
  0x1a   :  { %s19_s8 = sshll.u32 %s2898_s7, 4  ;;  %s43_s10 = sshll.u32 %s2899_s9, 4  ;;  %s20_s8 = int_to_ptr.vmem [resolvable:$true] %s19_s8  ;;  %s44_s10 = int_to_ptr.vmem [resolvable:$true] %s43_s10 }
  0x1b   :  { %s2812_s1 = scalar_lea.vmem %s20_s8, 2048  ;;  %p2817_p11 = scmp.lt.s32.totalorder %s20_s8, %s20_s8 }
  0x1c   :  { %p2813_p10 = scmp.ne.s32.totalorder %s20_s8, %s2812_s1  ;;  %p2818_p12 = scmp.lt.s32.totalorder %s2812_s1, %s2812_s1 }
  0x1e   :  { %p2819_p13 = por %p2818_p12, %p2817_p11 }
  0x20   :  { %p2820_p0 = pnand %p2819_p13, %p2813_p10 }
  0x22   :  { %2823 = shalt.err (!%p2820_p0)
}
  0x23   :  { %25 = dma.hbm_to_vmem [thread:$0]  %s3507_s0, 2048, %s20_s8, [#allocation4], %s2894_s23, %s2894_s23, %s2895_s24  }
  0x24   :  { %s2832_s3 = scalar_lea.vmem %s44_s10, 2048  ;;  %p2837_p2 = scmp.lt.s32.totalorder %s44_s10, %s44_s10 }
  0x25   :  { %p2833_p1 = scmp.ne.s32.totalorder %s44_s10, %s2832_s3  ;;  %p2838_p3 = scmp.lt.s32.totalorder %s2832_s3, %s2832_s3 }
  0x27   :  { %p2839_p4 = por %p2838_p3, %p2837_p2 }
  0x29   :  { %p2840_p5 = pnand %p2839_p4, %p2833_p1 }
  0x2b   :  { %2843 = shalt.err (!%p2840_p5)
}
  0x2c   :  { %49 = dma.hbm_to_vmem [thread:$0]  %s3509_s2, 2048, %s44_s10, [#allocation7], %s2894_s23, %s2894_s23, %s2895_s24  }
  0x2d   :  { %s2900_s15 = smov [#allocation11]  }
  0x2e   :  { %s68_s16 = sshll.u32 %s2900_s15, 4  ;;  %s69_s16 = int_to_ptr.vmem [resolvable:$true] %s68_s16 }
  0x2f   :  { %s2852_s17 = scalar_lea.vmem %s69_s16, 384  ;;  %p2857_p7 = scmp.lt.s32.totalorder %s69_s16, %s69_s16 }
  0x30   :  { %p2853_p6 = scmp.ne.s32.totalorder %s69_s16, %s2852_s17  ;;  %p2858_p8 = scmp.lt.s32.totalorder %s2852_s17, %s2852_s17 }
  0x32   :  { %p2859_p9 = por %p2858_p8, %p2857_p7 }
  0x34   :  { %p2860_p10 = pnand %p2859_p9, %p2853_p6 }
  0x36   :  { %2863 = shalt.err (!%p2860_p10)
}
  0x37   :  { %71 = dma.hbm_to_vmem [thread:$0]  %s3511_s4, 384, %s69_s16, [#allocation10]  }
  0x38   :  { %2884 = dma.done.wait [#allocation4], 2048  }
  0x39   :  { %2885 = vsyncadd [#allocation4], 4294965248 }
  0x3a   :  { %2886 = dma.done.wait [#allocation7], 4096  }
  0x3b   :  { %2887 = vsyncadd [#allocation7], 4294963200 }
  0x3c   :  { %2888 = dma.done.wait [#allocation10], 31104  }
  0x3d   :  { %2889 = vsyncadd [#allocation10], 4294936192  ;;  %v2901_v0 = vmov 0.0   ;;  %v154_v1 = vld [vmem:[#allocation6 + $0x78] sm:$0xff]  ;;  %v153_v2 = vld [vmem:[#allocation6 + $0x70] sm:$0xff]  ;;  %s2902_s2 = smov [#allocation12]  }
  0x3e   :  { %578 = vmatprep.mubr.f32.mxu1 %v2901_v0  ;;  %2240 = vmatprep.subr.mxu0 %v154_v1  ;;  %v152_v3 = vld [vmem:[#allocation6 + $0x68] sm:$0xff]  ;;  %v151_v4 = vld [vmem:[#allocation6 + $0x60] sm:$0xff]  ;;  %v150_v6 = vld [vmem:[#allocation6 + $0x58] sm:$0xff]  ;;  %s2002_s4 = sshll.u32 %s2902_s2, 4  ;;  %s2003_s4 = int_to_ptr.vmem [resolvable:$true] %s2002_s4 }
  0x3f   :  { %2241 = vmatpush3.msra.mxu0 %v154_v1  ;;  %v123_v5 = vld [vmem:[#allocation3] sm:$0xff]  ;;  %v149_v7 = vld [vmem:[#allocation6 + $0x50] sm:$0xff]  ;;  %v148_v8 = vld [vmem:[#allocation6 + $0x48] sm:$0xff]  ;;  %s2864_s19 = scalar_lea.vmem %s2003_s4, 2048  ;;  %p2869_p12 = scmp.lt.s32.totalorder %s2003_s4, %s2003_s4 }
  0x40   :  { %2242 = vmatprep.subr.mxu0 %v153_v2  ;;  %2272 = vmatprep.mubr.f32.mxu0 %v123_v5  ;;  %v461_v9 = vld [vmem:[#allocation9 + $0x2f0] sm:$0xff]  ;;  %v460_v10 = vld [vmem:[#allocation9 + $0x2e8] sm:$0xff]  ;;  %v458_v11 = vld [vmem:[#allocation9 + $0x2d8] sm:$0xff]  ;;  %p2865_p11 = scmp.ne.s32.totalorder %s2003_s4, %s2864_s19  ;;  %p2870_p13 = scmp.lt.s32.totalorder %s2864_s19, %s2864_s19 }
  0x41   :  { %2243 = vmatpush3.msra.mxu0 %v153_v2  ;;  %514 = vmatprep.subr.mxu1 %v461_v9  ;;  %v457_v12 = vld [vmem:[#allocation9 + $0x2d0] sm:$0xff]  ;;  %v147_v13 = vld [vmem:[#allocation6 + $0x40] sm:$0xff]  ;;  %v454_v15 = vld [vmem:[#allocation9 + $0x2b8] sm:$0xff] }
  0x42   :  { %2244 = vmatprep.subr.mxu0 %v152_v3  ;;  %515 = vmatpush1.msra.mxu1 %v460_v10  ;;  %v455_v14 = vld [vmem:[#allocation9 + $0x2c0] sm:$0xff]  ;;  %v146_v16 = vld [vmem:[#allocation6 + $0x38] sm:$0xff]  ;;  %v452_v17 = vld [vmem:[#allocation9 + $0x2a8] sm:$0xff]  ;;  %p2871_p0 = por %p2870_p13, %p2869_p12 }
  0x43   :  { %2245 = vmatpush3.msra.mxu0 %v152_v3  ;;  %516 = vmatprep.subr.mxu1 %v458_v11  ;;  %v451_v18 = vld [vmem:[#allocation9 + $0x2a0] sm:$0xff]  ;;  %v145_v19 = vld [vmem:[#allocation6 + $0x30] sm:$0xff]  ;;  %v448_v21 = vld [vmem:[#allocation9 + $0x288] sm:$0xff] }
  0x44   :  { %2246 = vmatprep.subr.mxu0 %v151_v4  ;;  %517 = vmatpush1.msra.mxu1 %v457_v12  ;;  %v449_v20 = vld [vmem:[#allocation9 + $0x290] sm:$0xff]  ;;  %v144_v22 = vld [vmem:[#allocation6 + $0x28] sm:$0xff]  ;;  %v446_v23 = vld [vmem:[#allocation9 + $0x278] sm:$0xff]  ;;  %p2872_p1 = pnand %p2871_p0, %p2865_p11 }
  0x45   :  { %2247 = vmatpush3.msra.mxu0 %v151_v4  ;;  %518 = vmatprep.subr.mxu1 %v455_v14  ;;  %v445_v24 = vld [vmem:[#allocation9 + $0x270] sm:$0xff]  ;;  %v143_v25 = vld [vmem:[#allocation6 + $0x20] sm:$0xff]  ;;  %v442_v27 = vld [vmem:[#allocation9 + $0x258] sm:$0xff] }
  0x46   :  { %2248 = vmatprep.subr.mxu0 %v150_v6  ;;  %519 = vmatpush1.msra.mxu1 %v454_v15  ;;  %v443_v26 = vld [vmem:[#allocation9 + $0x260] sm:$0xff]  ;;  %v142_v28 = vld [vmem:[#allocation6 + $0x18] sm:$0xff]  ;;  %v440_v29 = vld [vmem:[#allocation9 + $0x248] sm:$0xff] }
  0x47   :  { %2249 = vmatpush3.msra.mxu0 %v150_v6  ;;  %520 = vmatprep.subr.mxu1 %v452_v17  ;;  %v439_v30 = vld [vmem:[#allocation9 + $0x240] sm:$0xff]  ;;  %v141_v31 = vld [vmem:[#allocation6 + $0x10] sm:$0xff]  ;;  %v436_v33 = vld [vmem:[#allocation9 + $0x228] sm:$0xff] }
  0x48   :  { %2250 = vmatprep.subr.mxu0 %v149_v7  ;;  %521 = vmatpush1.msra.mxu1 %v451_v18  ;;  %v437_v32 = vld [vmem:[#allocation9 + $0x230] sm:$0xff]  ;;  %v140_v34 = vld [vmem:[#allocation6 + $0x8] sm:$0xff]  ;;  %v434_v35 = vld [vmem:[#allocation9 + $0x218] sm:$0xff] }
  0x49   :  { %2251 = vmatpush3.msra.mxu0 %v149_v7  ;;  %522 = vmatprep.subr.mxu1 %v449_v20  ;;  %v433_v36 = vld [vmem:[#allocation9 + $0x210] sm:$0xff]  ;;  %v139_v37 = vld [vmem:[#allocation6] sm:$0xff]  ;;  %v430_v39 = vld [vmem:[#allocation9 + $0x1f8] sm:$0xff] }
  0x4a   :  { %2252 = vmatprep.subr.mxu0 %v148_v8  ;;  %523 = vmatpush1.msra.mxu1 %v448_v21  ;;  %v431_v38 = vld [vmem:[#allocation9 + $0x200] sm:$0xff]  ;;  %v124_v40 = vld [vmem:[#allocation3 + $0x8] sm:$0xff]  ;;  %v125_v42 = vld [vmem:[#allocation3 + $0x10] sm:$0xff] }
  0x4b   :  { %2253 = vmatpush3.msra.mxu0 %v148_v8  ;;  %524 = vmatprep.subr.mxu1 %v446_v23  ;;  %v428_v41 = vld [vmem:[#allocation9 + $0x1e8] sm:$0xff]  ;;  %v427_v43 = vld [vmem:[#allocation9 + $0x1e0] sm:$0xff]  ;;  %v425_v44 = vld [vmem:[#allocation9 + $0x1d0] sm:$0xff] }
  0x4c   :  { %2254 = vmatprep.subr.mxu0 %v147_v13  ;;  %525 = vmatpush1.msra.mxu1 %v445_v24  ;;  %v462_v45 = vld [vmem:[#allocation9 + $0x2f8] sm:$0xff]  ;;  %v424_v46 = vld [vmem:[#allocation9 + $0x1c8] sm:$0xff]  ;;  %v127_v49 = vld [vmem:[#allocation3 + $0x20] sm:$0xff] }
  0x4d   :  { %2255 = vmatpush3.msra.mxu0 %v147_v13  ;;  %526 = vmatprep.subr.mxu1 %v443_v26  ;;  %v126_v47 = vld [vmem:[#allocation3 + $0x18] sm:$0xff]  ;;  %v421_v50 = vld [vmem:[#allocation9 + $0x1b0] sm:$0xff]  ;;  %v419_v51 = vld [vmem:[#allocation9 + $0x1a0] sm:$0xff] }
  0x4e   :  { %2256 = vmatprep.subr.mxu0 %v146_v16  ;;  %527 = vmatpush1.msra.mxu1 %v442_v27  ;;  %v422_v48 = vld [vmem:[#allocation9 + $0x1b8] sm:$0xff]  ;;  %v459_v52 = vld [vmem:[#allocation9 + $0x2e0] sm:$0xff]  ;;  %v128_v54 = vld [vmem:[#allocation3 + $0x28] sm:$0xff] }
  0x4f   :  { %2257 = vmatpush3.msra.mxu0 %v146_v16  ;;  %528 = vmatprep.subr.mxu1 %v440_v29  ;;  %v418_v53 = vld [vmem:[#allocation9 + $0x198] sm:$0xff]  ;;  %v416_v55 = vld [vmem:[#allocation9 + $0x188] sm:$0xff]  ;;  %v129_v56 = vld [vmem:[#allocation3 + $0x30] sm:$0xff] }
  0x50   :  { %2258 = vmatprep.subr.mxu0 %v145_v19  ;;  %529 = vmatpush1.msra.mxu1 %v439_v30  ;;  %v415_v57 = vld [vmem:[#allocation9 + $0x180] sm:$0xff]  ;;  %v456_v59 = vld [vmem:[#allocation9 + $0x2c8] sm:$0xff]  ;;  %v130_v60 = vld [vmem:[#allocation3 + $0x38] sm:$0xff] }
  0x51   :  { %2259 = vmatpush3.msra.mxu0 %v145_v19  ;;  %530 = vmatprep.subr.mxu1 %v437_v32  ;;  %v2958_v58 = vld [vmem:[#allocation8] sm:$0xff]  ;;  %v453_v61 = vld [vmem:[#allocation9 + $0x2b0] sm:$0xff]  ;;  %v2962_v63 = vld [vmem:[#allocation8 + $0x8] sm:$0xff] }
  0x52   :  { %2260 = vmatprep.subr.mxu0 %v144_v22  ;;  %531 = vmatpush1.msra.mxu1 %v436_v33  ;;  %v131_v62 = vld [vmem:[#allocation3 + $0x40] sm:$0xff]  ;;  %v450_v1 = vld [vmem:[#allocation9 + $0x298] sm:$0xff]  ;;  %v132_v2 = vld [vmem:[#allocation3 + $0x48] sm:$0xff] }
  0x53   :  { %2261 = vmatpush3.msra.mxu0 %v144_v22  ;;  %532 = vmatprep.subr.mxu1 %v434_v35  ;;  %v447_v3 = vld [vmem:[#allocation9 + $0x280] sm:$0xff]  ;;  %v133_v4 = vld [vmem:[#allocation3 + $0x50] sm:$0xff]  ;;  %v444_v6 = vld [vmem:[#allocation9 + $0x268] sm:$0xff] }
  0x54   :  { %2262 = vmatprep.subr.mxu0 %v143_v25  ;;  %533 = vmatpush1.msra.mxu1 %v433_v36  ;;  %v2966_v5 = vld [vmem:[#allocation8 + $0x10] sm:$0xff]  ;;  %v134_v7 = vld [vmem:[#allocation3 + $0x58] sm:$0xff]  ;;  %v135_v9 = vld [vmem:[#allocation3 + $0x60] sm:$0xff] }
  0x55   :  { %2263 = vmatpush3.msra.mxu0 %v143_v25  ;;  %534 = vmatprep.subr.mxu1 %v431_v38  ;;  %v441_v8 = vld [vmem:[#allocation9 + $0x250] sm:$0xff]  ;;  %v2970_v10 = vld [vmem:[#allocation8 + $0x18] sm:$0xff]  ;;  %v136_v12 = vld [vmem:[#allocation3 + $0x68] sm:$0xff] }
  0x56   :  { %2264 = vmatprep.subr.mxu0 %v142_v28  ;;  %535 = vmatpush1.msra.mxu1 %v430_v39  ;;  %v438_v11 = vld [vmem:[#allocation9 + $0x238] sm:$0xff]  ;;  %v435_v13 = vld [vmem:[#allocation9 + $0x220] sm:$0xff]  ;;  %v137_v14 = vld [vmem:[#allocation3 + $0x70] sm:$0xff] }
  0x57   :  { %2265 = vmatpush3.msra.mxu0 %v142_v28  ;;  %536 = vmatprep.subr.mxu1 %v428_v41  ;;  %v2974_v15 = vld [vmem:[#allocation8 + $0x20] sm:$0xff]  ;;  %v432_v16 = vld [vmem:[#allocation9 + $0x208] sm:$0xff]  ;;  %v138_v17 = vld [vmem:[#allocation3 + $0x78] sm:$0xff] }
  0x58   :  { %2266 = vmatprep.subr.mxu0 %v141_v31  ;;  %537 = vmatpush1.msra.mxu1 %v427_v43  ;;  %v429_v18 = vld [vmem:[#allocation9 + $0x1f0] sm:$0xff]  ;;  %v356_v19 = vld [vmem:[#allocation8 + $0x28] sm:$0xff]  ;;  %v426_v20 = vld [vmem:[#allocation9 + $0x1d8] sm:$0xff] }
  0x59   :  { %2267 = vmatpush3.msra.mxu0 %v141_v31  ;;  %538 = vmatprep.subr.mxu1 %v425_v44  ;;  %v423_v21 = vld [vmem:[#allocation9 + $0x1c0] sm:$0xff]  ;;  %v414_v22 = vld [vmem:[#allocation9 + $0x178] sm:$0xff]  ;;  %v357_v23 = vld [vmem:[#allocation8 + $0x30] sm:$0xff] }
  0x5a   :  { %2268 = vmatprep.subr.mxu0 %v140_v34  ;;  %539 = vmatpush1.msra.mxu1 %v424_v46  ;;  %v420_v24 = vld [vmem:[#allocation9 + $0x1a8] sm:$0xff]  ;;  %v417_v25 = vld [vmem:[#allocation9 + $0x190] sm:$0xff]  ;;  %v411_v26 = vld [vmem:[#allocation9 + $0x160] sm:$0xff] }
  0x5b   :  { %2269 = vmatpush3.msra.mxu0 %v140_v34  ;;  %540 = vmatprep.subr.mxu1 %v422_v48  ;;  %v358_v27 = vld [vmem:[#allocation8 + $0x38] sm:$0xff]  ;;  %v413_v28 = vld [vmem:[#allocation9 + $0x170] sm:$0xff]  ;;  %v412_v29 = vld [vmem:[#allocation9 + $0x168] sm:$0xff] }
  0x5c   :  { %2270 = vmatprep.subr.mxu0 %v139_v37  ;;  %541 = vmatpush1.msra.mxu1 %v421_v50  ;;  %v410_v30 = vld [vmem:[#allocation9 + $0x158] sm:$0xff]  ;;  %v408_v31 = vld [vmem:[#allocation9 + $0x148] sm:$0xff]  ;;  %v359_v32 = vld [vmem:[#allocation8 + $0x40] sm:$0xff] }
  0x5d   :  { %2271 = vmatpush3.msra.mxu0 %v139_v37  ;;  %542 = vmatprep.subr.mxu1 %v419_v51  ;;  %v409_v33 = vld [vmem:[#allocation9 + $0x150] sm:$0xff]  ;;  %v407_v34 = vld [vmem:[#allocation9 + $0x140] sm:$0xff]  ;;  %v406_v35 = vld [vmem:[#allocation9 + $0x138] sm:$0xff] }
  0x5e   :  { %2273 = vmatmul.mubr.f32.vlgmr.msra.gmra.mxu0 %v124_v40  ;;  %2296 = vmatprep.subr.mxu0 %v462_v45  ;;  %v360_v36 = vld [vmem:[#allocation8 + $0x48] sm:$0xff]  ;;  %v405_v38 = vld [vmem:[#allocation9 + $0x130] sm:$0xff]  ;;  %v403_v39 = vld [vmem:[#allocation9 + $0x120] sm:$0xff] }
  0x5f   :  { %2275 = vmatprep.mubr.f32.mxu0 %v125_v42  ;;  %2297 = vmatpush3.msra.mxu0 %v462_v45  ;;  %v404_v37 = vld [vmem:[#allocation9 + $0x128] sm:$0xff]  ;;  %v401_v40 = vld [vmem:[#allocation9 + $0x110] sm:$0xff]  ;;  %v398_v43 = vld [vmem:[#allocation9 + $0xf8] sm:$0xff] }
  0x60   :  { %2298 = vmatprep.subr.mxu0 %v459_v52  ;;  %543 = vmatpush1.msra.mxu1 %v418_v53  ;;  %v400_v41 = vld [vmem:[#allocation9 + $0x108] sm:$0xff]  ;;  %v2987_v42 = vld [vmem:[#allocation8 + $0x50] sm:$0xff]  ;;  %v402_v44 = vld [vmem:[#allocation9 + $0x118] sm:$0xff] }
  0x61   :  { %2299 = vmatpush3.msra.mxu0 %v459_v52  ;;  %544 = vmatprep.subr.mxu1 %v416_v55  ;;  %v397_v45 = vld [vmem:[#allocation9 + $0xf0] sm:$0xff]  ;;  %v395_v46 = vld [vmem:[#allocation9 + $0xe0] sm:$0xff]  ;;  %v394_v48 = vld [vmem:[#allocation9 + $0xd8] sm:$0xff] }
  0x62   :  { %2276 = vmatmul.mubr.f32.gmra.mxu0 %v126_v47  ;;  %545 = vmatpush1.msra.mxu1 %v415_v57  ;;  %v399_v47 = vld [vmem:[#allocation9 + $0x100] sm:$0xff]  ;;  %v392_v50 = vld [vmem:[#allocation9 + $0xc8] sm:$0xff]  ;;  %v389_v53 = vld [vmem:[#allocation9 + $0xb0] sm:$0xff] }
  0x63   :  { %2278 = vmatprep.mubr.f32.mxu0 %v127_v49  ;;  %579 = vmatmul.mubr.f32.vlgmr.msra.gmra.mxu1 %v2958_v58  ;;  %v2991_v49 = vld [vmem:[#allocation8 + $0x58] sm:$0xff]  ;;  %v396_v51 = vld [vmem:[#allocation9 + $0xe8] sm:$0xff]  ;;  %v391_v52 = vld [vmem:[#allocation9 + $0xc0] sm:$0xff] }
  0x64   :  { %2300 = vmatprep.subr.mxu0 %v456_v59  ;;  %584 = vmatprep.mubr.f32.mxu1 %v2901_v0  ;;  %v388_v55 = vld [vmem:[#allocation9 + $0xa8] sm:$0xff]  ;;  %v386_v57 = vld [vmem:[#allocation9 + $0x98] sm:$0xff] }
  0x65   :  { %2301 = vmatpush3.msra.mxu0 %v456_v59  ;;  %2352 = vmatprep.subr.mxu1 %v414_v22  ;;  %v385_v59 = vld [vmem:[#allocation9 + $0x90] sm:$0xff] }
  0x66   :  { %2279 = vmatmul.mubr.f32.gmra.mxu0 %v128_v54  ;;  %2302 = vmatprep.subr.mxu0 %v453_v61  ;;  %v393_v54 = vld [vmem:[#allocation9 + $0xd0] sm:$0xff] }
  0x67   :  { %2281 = vmatprep.mubr.f32.mxu0 %v129_v56  ;;  %2303 = vmatpush3.msra.mxu0 %v453_v61  ;;  %v2995_v56 = vld [vmem:[#allocation8 + $0x60] sm:$0xff] }
  0x68   :  { %585 = vmatmul.mubr.f32.gmra.mxu1 %v2962_v63  ;;  %2304 = vmatprep.subr.mxu0 %v450_v1  ;;  %v387_v61 = vld [vmem:[#allocation9 + $0xa0] sm:$0xff] }
  0x69   :  { %2305 = vmatpush3.msra.mxu0 %v450_v1  ;;  %590 = vmatprep.mubr.f32.mxu1 %v2901_v0  ;;  %v380_v1 = vld [vmem:[#allocation9 + $0x68] sm:$0xff] }
  0x6a   :  { %2282 = vmatmul.mubr.f32.gmra.mxu0 %v130_v60  ;;  %2306 = vmatprep.subr.mxu0 %v447_v3  ;;  %v383_v60 = vld [vmem:[#allocation9 + $0x80] sm:$0xff] }
  0x6b   :  { %2284 = vmatprep.mubr.f32.mxu0 %v131_v62  ;;  %2307 = vmatpush3.msra.mxu0 %v447_v3  ;;  %v382_v62 = vld [vmem:[#allocation9 + $0x78] sm:$0xff]  ;;  %v379_v3 = vld [vmem:[#allocation9 + $0x60] sm:$0xff] }
  0x6c   :  { %591 = vmatmul.mubr.f32.gmra.mxu1 %v2966_v5  ;;  %2308 = vmatprep.subr.mxu0 %v444_v6 }
  0x6d   :  { %2309 = vmatpush3.msra.mxu0 %v444_v6  ;;  %596 = vmatprep.mubr.f32.mxu1 %v2901_v0  ;;  %v376_v6 = vld [vmem:[#allocation9 + $0x48] sm:$0xff] }
  0x6e   :  { %2285 = vmatmul.mubr.f32.gmra.mxu0 %v132_v2  ;;  %2310 = vmatprep.subr.mxu0 %v441_v8  ;;  %v384_v2 = vld [vmem:[#allocation9 + $0x88] sm:$0xff] }
  0x6f   :  { %2287 = vmatprep.mubr.f32.mxu0 %v133_v4  ;;  %2311 = vmatpush3.msra.mxu0 %v441_v8  ;;  %v377_v4 = vld [vmem:[#allocation9 + $0x50] sm:$0xff]  ;;  %v374_v8 = vld [vmem:[#allocation9 + $0x38] sm:$0xff] }
  0x70   :  { %597 = vmatmul.mubr.f32.gmra.mxu1 %v2970_v10  ;;  %2312 = vmatprep.subr.mxu0 %v438_v11 }
  0x71   :  { %2313 = vmatpush3.msra.mxu0 %v438_v11  ;;  %602 = vmatprep.mubr.f32.mxu1 %v2901_v0  ;;  %v373_v11 = vld [vmem:[#allocation9 + $0x30] sm:$0xff] }
  0x72   :  { %2288 = vmatmul.mubr.f32.gmra.mxu0 %v134_v7  ;;  %2314 = vmatprep.subr.mxu0 %v435_v13  ;;  %v3007_v7 = vld [vmem:[#allocation8 + $0x70] sm:$0xff] }
  0x73   :  { %2290 = vmatprep.mubr.f32.mxu0 %v135_v9  ;;  %2315 = vmatpush3.msra.mxu0 %v435_v13  ;;  %v378_v9 = vld [vmem:[#allocation9 + $0x58] sm:$0xff]  ;;  %v375_v13 = vld [vmem:[#allocation9 + $0x40] sm:$0xff] }
  0x74   :  { %603 = vmatmul.mubr.f32.gmra.mxu1 %v2974_v15  ;;  %2316 = vmatprep.subr.mxu0 %v432_v16 }
  0x75   :  { %2317 = vmatpush3.msra.mxu0 %v432_v16  ;;  %608 = vmatprep.mubr.f32.mxu1 %v2901_v0  ;;  %v372_v16 = vld [vmem:[#allocation9 + $0x28] sm:$0xff] }
  0x76   :  { %2291 = vmatmul.mubr.f32.gmra.mxu0 %v136_v12  ;;  %2318 = vmatprep.subr.mxu0 %v429_v18  ;;  %v371_v12 = vld [vmem:[#allocation9 + $0x20] sm:$0xff] }
  0x77   :  { %2293 = vmatprep.mubr.f32.mxu0 %v137_v14  ;;  %2319 = vmatpush3.msra.mxu0 %v429_v18  ;;  %v370_v14 = vld [vmem:[#allocation9 + $0x18] sm:$0xff]  ;;  %v369_v18 = vld [vmem:[#allocation9 + $0x10] sm:$0xff] }
  0x78   :  { %609 = vmatmul.mubr.f32.gmra.mxu1 %v356_v19  ;;  %2320 = vmatprep.subr.mxu0 %v426_v20 }
  0x79   :  { %2321 = vmatpush3.msra.mxu0 %v426_v20  ;;  %614 = vmatprep.mubr.f32.mxu1 %v2901_v0 }
  0x7a   :  { %2294 = vmatmul.mubr.f32.gmra.mxu0 %v138_v17  ;;  %2322 = vmatprep.subr.mxu0 %v423_v21  ;;  %v367_v17 = vld [vmem:[#allocation9] sm:$0xff] }
  0x7b   :  { %2328 = vmatprep.mubr.f32.mxu0 %v2958_v58  ;;  %2323 = vmatpush3.msra.mxu0 %v423_v21  ;;  %v390_v58 = vld [vmem:[#allocation9 + $0xb8] sm:$0xff] }
  0x7c   :  { %2353 = vmatpush3.msra.mxu1 %v414_v22  ;;  %2324 = vmatprep.subr.mxu0 %v420_v24 }
  0x7d   :  { %615 = vmatmul.mubr.f32.gmra.mxu1 %v357_v23  ;;  %2325 = vmatpush3.msra.mxu0 %v420_v24 }
  0x7e   :  { %620 = vmatprep.mubr.f32.mxu1 %v2901_v0  ;;  %2326 = vmatprep.subr.mxu0 %v417_v25 }
  0x7f   :  { %2354 = vmatprep.subr.mxu1 %v411_v26  ;;  %2327 = vmatpush3.msra.mxu0 %v417_v25 }
  0x80   :  { %2355 = vmatpush3.msra.mxu1 %v411_v26  ;;  %2329 = vmatmul.mubr.f32.vlgmr.msra.gmra.mxu0 %v2962_v63  ;;  %v3001_v63 = vld [vmem:[#allocation8 + $0x68] sm:$0xff] }
  0x81   :  { %621 = vmatmul.mubr.f32.gmra.mxu1 %v358_v27  ;;  %820 = vmatprep.subr.mxu0 %v413_v28 }
  0x82   :  { %626 = vmatprep.mubr.f32.mxu1 %v2901_v0  ;;  %821 = vmatpush1.msra.mxu0 %v412_v29 }
  0x83   :  { %2331 = vmatprep.mubr.f32.mxu0 %v2966_v5  ;;  %822 = vmatprep.subr.mxu0 %v410_v30  ;;  %v381_v5 = vld [vmem:[#allocation9 + $0x70] sm:$0xff] }
  0x84   :  { %2356 = vmatprep.subr.mxu1 %v408_v31  ;;  %2332 = vmatmul.mubr.f32.gmra.mxu0 %v2970_v10  ;;  %v3010_v10 = vld [vmem:[#allocation8 + $0x78] sm:$0xff] }
  0x85   :  { %627 = vmatmul.mubr.f32.gmra.mxu1 %v359_v32  ;;  %823 = vmatpush1.msra.mxu0 %v409_v33 }
  0x86   :  { %632 = vmatprep.mubr.f32.mxu1 %v2901_v0  ;;  %824 = vmatprep.subr.mxu0 %v407_v34 }
  0x87   :  { %2334 = vmatprep.mubr.f32.mxu0 %v2974_v15  ;;  %825 = vmatpush1.msra.mxu0 %v406_v35  ;;  %v368_v15 = vld [vmem:[#allocation9 + $0x8] sm:$0xff] }
  0x88   :  { %2357 = vmatpush3.msra.mxu1 %v408_v31  ;;  %826 = vmatprep.subr.mxu0 %v404_v37 }
  0x89   :  { %633 = vmatmul.mubr.f32.gmra.mxu1 %v360_v36  ;;  %2335 = vmatmul.mubr.f32.gmra.mxu0 %v356_v19 }
  0x8a   :  { %2358 = vmatprep.subr.mxu1 %v405_v38  ;;  %827 = vmatpush1.msra.mxu0 %v403_v39 }
  0x8b   :  { %638 = vmatprep.mubr.f32.mxu1 %v2901_v0  ;;  %828 = vmatprep.subr.mxu0 %v401_v40  ;;  %v477_v40 = vld [vmem:[#allocation9 + $0x450] sm:$0xff] }
  0x8c   :  { %2359 = vmatpush3.msra.mxu1 %v405_v38  ;;  %829 = vmatpush1.msra.mxu0 %v400_v41  ;;  %v478_v38 = vld [vmem:[#allocation9 + $0x468] sm:$0xff] }
  0x8d   :  { %639 = vmatmul.mubr.f32.gmra.mxu1 %v2987_v42  ;;  %2337 = vmatprep.mubr.f32.mxu0 %v357_v23 }
  0x8e   :  { %830 = vmatprep.subr.mxu0 %v398_v43  ;;  %2360 = vmatprep.subr.mxu1 %v402_v44  ;;  %v476_v43 = vld [vmem:[#allocation9 + $0x438] sm:$0xff] }
  0x8f   :  { %2338 = vmatmul.mubr.f32.gmra.mxu0 %v358_v27  ;;  %2361 = vmatpush3.msra.mxu1 %v402_v44 }
  0x90   :  { %831 = vmatpush1.msra.mxu0 %v397_v45  ;;  %2362 = vmatprep.subr.mxu1 %v399_v47  ;;  %v474_v45 = vld [vmem:[#allocation9 + $0x408] sm:$0xff] }
  0x91   :  { %832 = vmatprep.subr.mxu0 %v395_v46  ;;  %644 = vmatprep.mubr.f32.mxu1 %v2901_v0  ;;  %v473_v46 = vld [vmem:[#allocation9 + $0x3f0] sm:$0xff] }
  0x92   :  { %833 = vmatpush1.msra.mxu0 %v394_v48  ;;  %2363 = vmatpush3.msra.mxu1 %v399_v47  ;;  %v472_v48 = vld [vmem:[#allocation9 + $0x3d8] sm:$0xff] }
  0x93   :  { %2340 = vmatprep.mubr.f32.mxu0 %v359_v32  ;;  %645 = vmatmul.mubr.f32.gmra.mxu1 %v2991_v49 }
  0x94   :  { %834 = vmatprep.subr.mxu0 %v392_v50  ;;  %2364 = vmatprep.subr.mxu1 %v396_v51  ;;  %v471_v50 = vld [vmem:[#allocation9 + $0x3c0] sm:$0xff] }
  0x95   :  { %2341 = vmatmul.mubr.f32.gmra.mxu0 %v360_v36  ;;  %2365 = vmatpush3.msra.mxu1 %v396_v51 }
  0x96   :  { %835 = vmatpush1.msra.mxu0 %v391_v52  ;;  %2366 = vmatprep.subr.mxu1 %v393_v54  ;;  %v470_v52 = vld [vmem:[#allocation9 + $0x3a8] sm:$0xff] }
  0x97   :  { %836 = vmatprep.subr.mxu0 %v389_v53  ;;  %650 = vmatprep.mubr.f32.mxu1 %v2901_v0  ;;  %v469_v53 = vld [vmem:[#allocation9 + $0x390] sm:$0xff] }
  0x98   :  { %837 = vmatpush1.msra.mxu0 %v388_v55  ;;  %2367 = vmatpush3.msra.mxu1 %v393_v54  ;;  %v468_v55 = vld [vmem:[#allocation9 + $0x378] sm:$0xff] }
  0x99   :  { %2343 = vmatprep.mubr.f32.mxu0 %v2987_v42  ;;  %651 = vmatmul.mubr.f32.gmra.mxu1 %v2995_v56 }
  0x9a   :  { %838 = vmatprep.subr.mxu0 %v386_v57  ;;  %2368 = vmatprep.subr.mxu1 %v390_v58  ;;  %v467_v57 = vld [vmem:[#allocation9 + $0x360] sm:$0xff] }
  0x9b   :  { %2344 = vmatmul.mubr.f32.gmra.mxu0 %v2991_v49  ;;  %2369 = vmatpush3.msra.mxu1 %v390_v58 }
  0x9c   :  { %839 = vmatpush1.msra.mxu0 %v385_v59  ;;  %2370 = vmatprep.subr.mxu1 %v387_v61  ;;  %v466_v59 = vld [vmem:[#allocation9 + $0x348] sm:$0xff] }
  0x9d   :  { %840 = vmatprep.subr.mxu0 %v383_v60  ;;  %656 = vmatprep.mubr.f32.mxu1 %v2901_v0  ;;  %v465_v60 = vld [vmem:[#allocation9 + $0x330] sm:$0xff] }
  0x9e   :  { %841 = vmatpush1.msra.mxu0 %v382_v62  ;;  %2371 = vmatpush3.msra.mxu1 %v387_v61  ;;  %v464_v62 = vld [vmem:[#allocation9 + $0x318] sm:$0xff] }
  0x9f   :  { %2346 = vmatprep.mubr.f32.mxu0 %v2995_v56  ;;  %657 = vmatmul.mubr.f32.gmra.mxu1 %v3001_v63 }
  0xa0   :  { %842 = vmatprep.subr.mxu0 %v380_v1  ;;  %2372 = vmatprep.subr.mxu1 %v384_v2  ;;  %v463_v1 = vld [vmem:[#allocation9 + $0x300] sm:$0xff] }
  0xa1   :  { %2347 = vmatmul.mubr.f32.gmra.mxu0 %v3001_v63  ;;  %2373 = vmatpush3.msra.mxu1 %v384_v2 }
  0xa2   :  { %843 = vmatpush1.msra.mxu0 %v379_v3  ;;  %2374 = vmatprep.subr.mxu1 %v381_v5 }
  0xa3   :  { %844 = vmatprep.subr.mxu0 %v377_v4  ;;  %662 = vmatprep.mubr.f32.mxu1 %v2901_v0 }
  0xa4   :  { %845 = vmatpush1.msra.mxu0 %v376_v6  ;;  %2375 = vmatpush3.msra.mxu1 %v381_v5 }
  0xa5   :  { %2349 = vmatprep.mubr.f32.mxu0 %v3007_v7  ;;  %663 = vmatmul.mubr.f32.gmra.mxu1 %v3007_v7 }
  0xa6   :  { %846 = vmatprep.subr.mxu0 %v374_v8  ;;  %2376 = vmatprep.subr.mxu1 %v378_v9 }
  0xa7   :  { %2350 = vmatmul.mubr.f32.gmra.mxu0 %v3010_v10  ;;  %2377 = vmatpush3.msra.mxu1 %v378_v9 }
  0xa8   :  { %847 = vmatpush1.msra.mxu0 %v373_v11  ;;  %2378 = vmatprep.subr.mxu1 %v375_v13 }
  0xa9   :  { %848 = vmatprep.subr.mxu0 %v371_v12  ;;  %668 = vmatprep.mubr.f32.mxu1 %v2901_v0 }
  0xaa   :  { %849 = vmatpush1.msra.mxu0 %v370_v14  ;;  %2379 = vmatpush3.msra.mxu1 %v375_v13 }
  0xab   :  { %850 = vmatprep.subr.mxu0 %v368_v15  ;;  %669 = vmatmul.mubr.f32.gmra.mxu1 %v3010_v10 }
  0xac   :  { %2380 = vmatprep.subr.mxu1 %v372_v16  ;;  %851 = vmatpush1.msra.mxu0 %v367_v17 }
  0xad   :  { %2381 = vmatpush3.msra.mxu1 %v372_v16  ;;  %884 = vmatprep.mubr.f32.mxu0 %v2901_v0 }
  0xae   :  { %2382 = vmatprep.subr.mxu1 %v369_v18 }
  0xaf   :  { %2383 = vmatpush3.msra.mxu1 %v369_v18 }
  0xb0   :  { %2408 = vmatprep.subr.mxu1 %v478_v38 }
 0x11e   :  { %v2274_v19 = vpop.f32.mrf.mxu0 }
 0x120   :  { %v221_v20 = vpop.f32.mrf.mxu0 }
 0x121   :  { %885 = vmatmul.mubr.f32.vlgmr.msra.gmra.mxu0 %v221_v20  ;;  %2384 = vmatprep.mubr.f32.mxu1 %v221_v20 }
 0x122   :  { %v2277_v21 = vpop.f32.mrf.mxu0  ;;  %2385 = vmatmul.mubr.f32.vlgmr.msra.gmra.mxu1 %v2274_v19  ;;  %890 = vmatprep.mubr.f32.mxu0 %v2901_v0 }
 0x123   :  { %v3033_v35 = vpop.f32.mrf.mxu1  ;;  %2409 = vmatpush3.msra.mxu1 %v478_v38 }
 0x124   :  { %v231_v22 = vpop.f32.mrf.mxu0  ;;  %2410 = vmatprep.subr.mxu1 %v477_v40 }
 0x125   :  { %891 = vmatmul.mubr.f32.gmra.mxu0 %v2274_v19  ;;  %2387 = vmatprep.mubr.f32.mxu1 %v231_v22  ;;  %v3035_v36 = vpop.f32.mrf.mxu1 }
 0x126   :  { %v2280_v23 = vpop.f32.mrf.mxu0  ;;  %2388 = vmatmul.mubr.f32.gmra.mxu1 %v2277_v21  ;;  %896 = vmatprep.mubr.f32.mxu0 %v2901_v0 }
 0x127   :  { %2411 = vmatpush3.msra.mxu1 %v477_v40 }
 0x128   :  { %v241_v24 = vpop.f32.mrf.mxu0  ;;  %v3037_v37 = vpop.f32.mrf.mxu1  ;;  %2412 = vmatprep.subr.mxu1 %v476_v43 }
 0x129   :  { %897 = vmatmul.mubr.f32.gmra.mxu0 %v231_v22  ;;  %2390 = vmatprep.mubr.f32.mxu1 %v241_v24 }
 0x12a   :  { %v2283_v25 = vpop.f32.mrf.mxu0  ;;  %2391 = vmatmul.mubr.f32.gmra.mxu1 %v2280_v23  ;;  %902 = vmatprep.mubr.f32.mxu0 %v2901_v0  ;;  %v3039_v39 = vpop.f32.mrf.mxu1 }
 0x12b   :  { %2413 = vmatpush3.msra.mxu1 %v476_v43 }
 0x12c   :  { %v251_v26 = vpop.f32.mrf.mxu0  ;;  %v3041_v41 = vpop.f32.mrf.mxu1 }
 0x12d   :  { %903 = vmatmul.mubr.f32.gmra.mxu0 %v2277_v21  ;;  %2393 = vmatprep.mubr.f32.mxu1 %v251_v26 }
 0x12e   :  { %v2286_v27 = vpop.f32.mrf.mxu0  ;;  %2394 = vmatmul.mubr.f32.gmra.mxu1 %v2283_v25  ;;  %908 = vmatprep.mubr.f32.mxu0 %v2901_v0  ;;  %v3043_v44 = vpop.f32.mrf.mxu1 }
 0x130   :  { %v261_v28 = vpop.f32.mrf.mxu0  ;;  %v3045_v47 = vpop.f32.mrf.mxu1 }
 0x131   :  { %909 = vmatmul.mubr.f32.gmra.mxu0 %v241_v24  ;;  %2396 = vmatprep.mubr.f32.mxu1 %v261_v28 }
 0x132   :  { %v2289_v29 = vpop.f32.mrf.mxu0  ;;  %2397 = vmatmul.mubr.f32.gmra.mxu1 %v2286_v27  ;;  %914 = vmatprep.mubr.f32.mxu0 %v2901_v0  ;;  %v3047_v51 = vpop.f32.mrf.mxu1 }
 0x134   :  { %v271_v30 = vpop.f32.mrf.mxu0  ;;  %v3049_v54 = vpop.f32.mrf.mxu1 }
 0x135   :  { %915 = vmatmul.mubr.f32.gmra.mxu0 %v2280_v23  ;;  %2399 = vmatprep.mubr.f32.mxu1 %v271_v30 }
 0x136   :  { %v2292_v31 = vpop.f32.mrf.mxu0  ;;  %2400 = vmatmul.mubr.f32.gmra.mxu1 %v2289_v29  ;;  %920 = vmatprep.mubr.f32.mxu0 %v2901_v0  ;;  %v3051_v58 = vpop.f32.mrf.mxu1 }
 0x138   :  { %v281_v32 = vpop.f32.mrf.mxu0  ;;  %v3053_v61 = vpop.f32.mrf.mxu1 }
 0x139   :  { %921 = vmatmul.mubr.f32.gmra.mxu0 %v251_v26  ;;  %2402 = vmatprep.mubr.f32.mxu1 %v281_v32 }
 0x13a   :  { %v2295_v33 = vpop.f32.mrf.mxu0  ;;  %2403 = vmatmul.mubr.f32.gmra.mxu1 %v2292_v31  ;;  %926 = vmatprep.mubr.f32.mxu0 %v2901_v0  ;;  %v3055_v2 = vpop.f32.mrf.mxu1 }
 0x13c   :  { %v291_v34 = vpop.f32.mrf.mxu0 }
 0x13d   :  { %927 = vmatmul.mubr.f32.gmra.mxu0 %v2283_v25  ;;  %2405 = vmatprep.mubr.f32.mxu1 %v291_v34  ;;  %v3057_v3 = vpop.f32.mrf.mxu1 }
 0x13e   :  { %2406 = vmatmul.mubr.f32.gmra.mxu1 %v2295_v33  ;;  %932 = vmatprep.mubr.f32.mxu0 %v2901_v0 }
 0x13f   :  { %v3059_v4 = vpop.f32.mrf.mxu1 }
 0x140   :  { %v3067_v9 = vpop.f32.mrf.mxu0 }
 0x141   :  { %933 = vmatmul.mubr.f32.gmra.mxu0 %v261_v28  ;;  %v3061_v5 = vpop.f32.mrf.mxu1 }
 0x142   :  { %938 = vmatprep.mubr.f32.mxu0 %v2901_v0  ;;  %v3071_v12 = vpop.f32.mrf.mxu0 }
 0x143   :  { %v3063_v6 = vpop.f32.mrf.mxu1 }
 0x144   :  { %v3075_v14 = vpop.f32.mrf.mxu0 }
 0x145   :  { %939 = vmatmul.mubr.f32.gmra.mxu0 %v2286_v27  ;;  %v3065_v8 = vpop.f32.mrf.mxu1 }
 0x146   :  { %944 = vmatprep.mubr.f32.mxu0 %v2901_v0  ;;  %v3079_v16 = vpop.f32.mrf.mxu0 }
 0x147   :  { %v3069_v11 = vpop.f32.mrf.mxu1 }
 0x149   :  { %945 = vmatmul.mubr.f32.gmra.mxu0 %v271_v30  ;;  %v3073_v13 = vpop.f32.mrf.mxu1  ;;  %v3083_v18 = vpop.f32.mrf.mxu0  ;;  %v493_v30 = vld [vmem:[#allocation9 + $0x5d0] sm:$0xff] }
 0x14a   :  { %950 = vmatprep.mubr.f32.mxu0 %v2901_v0 }
 0x14b   :  { %v3077_v15 = vpop.f32.mrf.mxu1  ;;  %v3087_v20 = vpop.f32.mrf.mxu0 }
 0x14d   :  { %951 = vmatmul.mubr.f32.gmra.mxu0 %v2289_v29  ;;  %v3081_v17 = vpop.f32.mrf.mxu1  ;;  %v494_v29 = vld [vmem:[#allocation9 + $0x5e8] sm:$0xff] }
 0x14e   :  { %956 = vmatprep.mubr.f32.mxu0 %v2901_v0  ;;  %2464 = vmatprep.subr.mxu0 %v494_v29 }
 0x14f   :  { %v3085_v19 = vpop.f32.mrf.mxu1  ;;  %v3091_v22 = vpop.f32.mrf.mxu0  ;;  %2465 = vmatpush3.msra.mxu0 %v494_v29 }
 0x150   :  { %3515 = vst [vmem:[#allocation17_spill] sm:$0xff] %v3091_v22  ;;  %2466 = vmatprep.subr.mxu0 %v493_v30 }
 0x151   :  { %957 = vmatmul.mubr.f32.gmra.mxu0 %v281_v32  ;;  %v3095_v24 = vpop.f32.mrf.mxu0 }
 0x152   :  { %962 = vmatprep.mubr.f32.mxu0 %v2901_v0  ;;  %3516 = vst [vmem:[#allocation18_spill] sm:$0xff] %v3095_v24  ;;  %2467 = vmatpush3.msra.mxu0 %v493_v30 }
 0x153   :  { %v3089_v21 = vpop.f32.mrf.mxu1 }
 0x155   :  { %963 = vmatmul.mubr.f32.gmra.mxu0 %v2292_v31  ;;  %v3093_v23 = vpop.f32.mrf.mxu1  ;;  %v3099_v26 = vpop.f32.mrf.mxu0  ;;  %v492_v31 = vld [vmem:[#allocation9 + $0x5b8] sm:$0xff] }
 0x156   :  { %968 = vmatprep.mubr.f32.mxu0 %v2901_v0  ;;  %3517 = vst [vmem:[#allocation19_spill] sm:$0xff] %v3099_v26  ;;  %2468 = vmatprep.subr.mxu0 %v492_v31 }
 0x157   :  { %v3103_v28 = vpop.f32.mrf.mxu0  ;;  %2469 = vmatpush3.msra.mxu0 %v492_v31 }
 0x158   :  { %3518 = vst [vmem:[#allocation20_spill] sm:$0xff] %v3103_v28 }
 0x159   :  { %969 = vmatmul.mubr.f32.gmra.mxu0 %v291_v34  ;;  %v3097_v25 = vpop.f32.mrf.mxu1 }
 0x15a   :  { %974 = vmatprep.mubr.f32.mxu0 %v2901_v0  ;;  %v475_v0 = vld [vmem:[#allocation9 + $0x420] sm:$0xff] }
 0x15b   :  { %2414 = vmatprep.subr.mxu1 %v475_v0  ;;  %v3101_v27 = vpop.f32.mrf.mxu1 }
 0x15c   :  { %2415 = vmatpush3.msra.mxu1 %v475_v0  ;;  %v1126_v0 = vlaneseq }
 0x15d   :  { %975 = vmatmul.mubr.f32.gmra.mxu0 %v2295_v33  ;;  %2416 = vmatprep.subr.mxu1 %v474_v45  ;;  %v3107_v33 = vpop.f32.mrf.mxu0 }
 0x15e   :  { %2417 = vmatpush3.msra.mxu1 %v474_v45  ;;  %3519 = vst [vmem:[#allocation21_spill] sm:$0xff] %v3107_v33 }
 0x15f   :  { %2418 = vmatprep.subr.mxu1 %v473_v46  ;;  %v3105_v32 = vpop.f32.mrf.mxu1  ;;  %v3111_v38 = vpop.f32.mrf.mxu0 }
 0x160   :  { %2419 = vmatpush3.msra.mxu1 %v473_v46  ;;  %3520 = vst [vmem:[#allocation22_spill] sm:$0xff] %v3111_v38 }
 0x161   :  { %2420 = vmatprep.subr.mxu1 %v472_v48  ;;  %v3109_v34 = vpop.f32.mrf.mxu1  ;;  %v3115_v43 = vpop.f32.mrf.mxu0 }
 0x162   :  { %2421 = vmatpush3.msra.mxu1 %v472_v48  ;;  %3521 = vst [vmem:[#allocation23_spill] sm:$0xff] %v3115_v43  ;;  %v3121_v48 = vshrl.u32 %v1126_v0, 7 }
 0x163   :  { %2422 = vmatprep.subr.mxu1 %v471_v50  ;;  %v3119_v46 = vpop.f32.mrf.mxu0 }
 0x164   :  { %2423 = vmatpush3.msra.mxu1 %v471_v50  ;;  %3522 = vst [vmem:[#allocation24_spill] sm:$0xff] %v3119_v46  ;;  %3523 = vst [vmem:[#allocation25_spill] sm:$0xff] %v3121_v48 }
 0x165   :  { %2424 = vmatprep.subr.mxu1 %v470_v52  ;;  %v3113_v40 = vpop.f32.mrf.mxu1 }
 0x166   :  { %2425 = vmatpush3.msra.mxu1 %v470_v52 }
 0x167   :  { %2426 = vmatprep.subr.mxu1 %v469_v53  ;;  %v3117_v45 = vpop.f32.mrf.mxu1  ;;  %v3125_v52 = vpop.f32.mrf.mxu0 }
 0x168   :  { %2427 = vmatpush3.msra.mxu1 %v469_v53  ;;  %3524 = vst [vmem:[#allocation26_spill] sm:$0xff] %v3125_v52  ;;  %v3128_v53 = vsub.s32 0, %v3121_v48 }
 0x169   :  { %2428 = vmatprep.subr.mxu1 %v468_v55 }
 0x16a   :  { %2429 = vmatpush3.msra.mxu1 %v468_v55  ;;  %v511_v55 = vld [vmem:[#allocation11] sm:$0xff] }
 0x16b   :  { %2430 = vmatprep.subr.mxu1 %v467_v57  ;;  %v3123_v50 = vpop.f32.mrf.mxu1 }
 0x16c   :  { %2431 = vmatpush3.msra.mxu1 %v467_v57 }
 0x16d   :  { %2432 = vmatprep.subr.mxu1 %v466_v59  ;;  %v3130_v57 = vpop.f32.mrf.mxu1 }
 0x16e   :  { %2433 = vmatpush3.msra.mxu1 %v466_v59  ;;  %v3132_v59 = vpop.f32.mrf.mxu0 }
 0x16f   :  { %2434 = vmatprep.subr.mxu1 %v465_v60 }
 0x170   :  { %2435 = vmatpush3.msra.mxu1 %v465_v60  ;;  %v512_v60 = vld [vmem:[#allocation11 + $0x8] sm:$0xff] }
 0x171   :  { %2436 = vmatprep.subr.mxu1 %v464_v62  ;;  %v3141_v31 = vrot.slane %v512_v60, %v3128_v53 }
 0x172   :  { %2437 = vmatpush3.msra.mxu1 %v464_v62  ;;  %v3135_v62 = vrot.slane %v511_v55, %v3128_v53 }
 0x173   :  { %2438 = vmatprep.subr.mxu1 %v463_v1 }
 0x174   :  { %2439 = vmatpush3.msra.mxu1 %v463_v1 }
 0x1e1   :  { %v886_v1 = vpop.f32.mrf.mxu0 }
 0x1e2   :  { %v887_v29 = vadd.f32 %v886_v1, %v3033_v35  ;;  %v3138_v30 = vpop.f32.mrf.mxu1 }
 0x1e3   :  { %v888_v0 = vpop.f32.mrf.mxu0 }
 0x1e4   :  { %v3144_v48 = vadd.f32 %v3135_v62, %v887_v29  ;;  %v889_v52 = vadd.f32 %v888_v0, %v3035_v36  ;;  %v3147_v46 = vpop.f32.mrf.mxu1 }
 0x1e5   :  { %v892_v43 = vpop.f32.mrf.mxu0 }
 0x1e6   :  { %v1139_v55 = vadd.f32 %v3141_v31, %v889_v52  ;;  %v893_v38 = vadd.f32 %v892_v43, %v3037_v37  ;;  %v3151_v33 = vpop.f32.mrf.mxu1 }
 0x1e7   :  { %v894_v35 = vpop.f32.mrf.mxu0 }
 0x1e8   :  { %v2032_v1 = vmul.f32 -1.442695, %v1139_v55  ;;  %v3154_v60 = vadd.f32 %v3135_v62, %v893_v38  ;;  %v895_v28 = vadd.f32 %v894_v35, %v3039_v39  ;;  %v3157_v29 = vpop.f32.mrf.mxu1 }
 0x1e9   :  { %v898_v26 = vpop.f32.mrf.mxu0 }
 0x1ea   :  { %2587 = vpow2.f32 %v2032_v1  ;;  %v1142_v36 = vadd.f32 %v3141_v31, %v895_v28  ;;  %v899_v0 = vadd.f32 %v898_v26, %v3041_v41  ;;  %v3161_v52 = vpop.f32.mrf.mxu1 }
 0x1eb   :  { %v900_v37 = vpop.f32.mrf.mxu0 }
 0x1ec   :  { %v2033_v43 = vmul.f32 -1.442695, %v1142_v36  ;;  %v3164_v24 = vadd.f32 %v3135_v62, %v899_v0  ;;  %v901_v38 = vadd.f32 %v900_v37, %v3043_v44  ;;  %v3167_v55 = vpop.f32.mrf.mxu1 }
 0x1ed   :  { %v904_v39 = vpop.f32.mrf.mxu0 }
 0x1ee   :  { %2589 = vpow2.f32 %v2033_v43  ;;  %v1145_v35 = vadd.f32 %v3141_v31, %v901_v38  ;;  %v905_v1 = vadd.f32 %v904_v39, %v3045_v47  ;;  %v3171_v28 = vpop.f32.mrf.mxu1 }
 0x1ef   :  { %3525 = vst [vmem:[#allocation27_spill] sm:$0xff] %v3171_v28  ;;  %v906_v41 = vpop.f32.mrf.mxu0 }
 0x1f0   :  { %v2034_v26 = vmul.f32 -1.442695, %v1145_v35  ;;  %v3174_v22 = vadd.f32 %v3135_v62, %v905_v1  ;;  %v907_v36 = vadd.f32 %v906_v41, %v3047_v51  ;;  %v3177_v0 = vpop.f32.mrf.mxu1 }
 0x1f1   :  { %3526 = vst [vmem:[#allocation28_spill] sm:$0xff] %v3177_v0  ;;  %v910_v44 = vpop.f32.mrf.mxu0 }
 0x1f2   :  { %2591 = vpow2.f32 %v2034_v26  ;;  %v1148_v37 = vadd.f32 %v3141_v31, %v907_v36  ;;  %v911_v43 = vadd.f32 %v910_v44, %v3049_v54  ;;  %v3181_v38 = vpop.f32.mrf.mxu1 }
 0x1f3   :  { %3527 = vst [vmem:[#allocation29_spill] sm:$0xff] %v3181_v38  ;;  %v912_v47 = vpop.f32.mrf.mxu0 }
 0x1f4   :  { %v2035_v39 = vmul.f32 -1.442695, %v1148_v37  ;;  %v3184_v28 = vadd.f32 %v3135_v62, %v911_v43  ;;  %v913_v35 = vadd.f32 %v912_v47, %v3051_v58  ;;  %v3187_v1 = vpop.f32.mrf.mxu1 }
 0x1f5   :  { %3528 = vst [vmem:[#allocation30_spill] sm:$0xff] %v3187_v1  ;;  %v916_v51 = vpop.f32.mrf.mxu0 }
 0x1f6   :  { %2593 = vpow2.f32 %v2035_v39  ;;  %v1151_v41 = vadd.f32 %v3141_v31, %v913_v35  ;;  %v3190_v26 = vpop.f32.mrf.mxu1  ;;  %v917_v54 = vadd.f32 %v916_v51, %v3053_v61 }
 0x1f7   :  { %3529 = vst [vmem:[#allocation31_spill] sm:$0xff] %v3190_v26  ;;  %v2588_v36 = vpop.eup %2587  ;;  %v918_v44 = vpop.f32.mrf.mxu0 }
 0x1f8   :  { %v1330_v38 = vadd.f32 1.0, %v2588_v36  ;;  %v2036_v0 = vmul.f32 -1.442695, %v1151_v41  ;;  %v919_v37 = vadd.f32 %v918_v44, %v3055_v2  ;;  %v3194_v43 = vpop.f32.mrf.mxu1  ;;  %v3197_v58 = vadd.f32 %v3135_v62, %v917_v54 }
 0x1f9   :  { %v922_v47 = vpop.f32.mrf.mxu0 }
 0x1fa   :  { %2595 = vrcp.f32 %v1330_v38  ;;  %v1154_v39 = vadd.f32 %v3141_v31, %v919_v37  ;;  %v923_v35 = vadd.f32 %v922_v47, %v3057_v3  ;;  %v3201_v26 = vpop.f32.mrf.mxu1  ;;  %v513_v3 = vld [vmem:[#allocation11 + $0x10] sm:$0xff] }
 0x1fb   :  { %3530 = vst [vmem:[#allocation32_spill] sm:$0xff] %v3201_v26  ;;  %v2590_v1 = vpop.eup %2589  ;;  %2597 = vpow2.f32 %v2036_v0  ;;  %v924_v61 = vpop.f32.mrf.mxu0 }
 0x1fc   :  { %v1331_v51 = vadd.f32 1.0, %v2590_v1  ;;  %v2037_v41 = vmul.f32 -1.442695, %v1154_v39  ;;  %v3204_v2 = vadd.f32 %v3135_v62, %v923_v35  ;;  %v3206_v36 = vpop.f32.mrf.mxu1  ;;  %v925_v54 = vadd.f32 %v924_v61, %v3059_v4 }
 0x1fd   :  { %3531 = vst [vmem:[#allocation33_spill] sm:$0xff] %v3206_v36  ;;  %v928_v44 = vpop.f32.mrf.mxu0 }
 0x1fe   :  { %2599 = vrcp.f32 %v1331_v51  ;;  %v929_v38 = vadd.f32 %v928_v44, %v3061_v5  ;;  %v3210_v37 = vpop.f32.mrf.mxu1  ;;  %v1157_v0 = vadd.f32 %v3141_v31, %v925_v54  ;;  %v3219_v5 = vrot.slane %v513_v3, %v3128_v53 }
 0x1ff   :  { %v2592_v47 = vpop.eup %2591  ;;  %2601 = vpow2.f32 %v2037_v41  ;;  %v930_v1 = vpop.f32.mrf.mxu0 }
 0x200   :  { %v1332_v39 = vadd.f32 1.0, %v2592_v47  ;;  %v3214_v35 = vadd.f32 %v3135_v62, %v929_v38  ;;  %v931_v36 = vadd.f32 %v930_v1, %v3063_v6  ;;  %v1117_v26 = vpop.f32.mrf.mxu1  ;;  %v2038_v4 = vmul.f32 -1.442695, %v1157_v0 }
 0x201   :  { %v1118_v61 = vadd.f32 %v1117_v26, %v3132_v59  ;;  %v934_v51 = vpop.f32.mrf.mxu0 }
 0x202   :  { %2603 = vrcp.f32 %v1332_v39  ;;  %v1160_v41 = vadd.f32 %v3141_v31, %v931_v36  ;;  %v935_v54 = vadd.f32 %v934_v51, %v3065_v8 }
 0x203   :  { %v2594_v44 = vpop.eup %2593  ;;  %2605 = vpow2.f32 %v2038_v4  ;;  %v936_v47 = vpop.f32.mrf.mxu0  ;;  %v3224_v38 = vadd.f32 %v3219_v5, %v1118_v61 }
 0x204   :  { %v1333_v6 = vadd.f32 1.0, %v2594_v44  ;;  %v2039_v1 = vmul.f32 -1.442695, %v1160_v41  ;;  %v937_v0 = vadd.f32 %v936_v47, %v3069_v11  ;;  %v3228_v59 = vadd.f32 %v3135_v62, %v935_v54  ;;  %v3236_v11 = vld [vmem:[#allocation8] sm:$0xff] }
 0x205   :  { %v940_v53 = vpop.f32.mrf.mxu0 }
 0x206   :  { %2607 = vrcp.f32 %v1333_v6  ;;  %v1163_v26 = vadd.f32 %v3141_v31, %v937_v0  ;;  %v941_v36 = vadd.f32 %v940_v53, %v3073_v13 }
 0x207   :  { %v2596_v3 = vpop.eup %2595  ;;  %2609 = vpow2.f32 %v2039_v1  ;;  %v942_v8 = vpop.f32.mrf.mxu0 }
 0x208   :  { %v2598_v39 = vpop.eup %2597  ;;  %v2040_v4 = vmul.f32 -1.442695, %v1163_v26  ;;  %v3233_v61 = vadd.f32 %v3135_v62, %v941_v36  ;;  %v943_v51 = vadd.f32 %v942_v8, %v3077_v15  ;;  %v1378_v41 = vmul.f32 %v3236_v11, %v2596_v3  ;;  %v3245_v8 = vld [vmem:[#allocation8 + $0x8] sm:$0xff] }
 0x209   :  { %v1334_v44 = vadd.f32 1.0, %v2598_v39  ;;  %v946_v54 = vpop.f32.mrf.mxu0 }
 0x20a   :  { %v1166_v47 = vadd.f32 %v3141_v31, %v943_v51  ;;  %v947_v13 = vadd.f32 %v946_v54, %v3081_v17  ;;  %2440 = vmatprep.mubr.f32.mxu1 %v1378_v41 }
 0x20b   :  { %v2600_v6 = vpop.eup %2599  ;;  %2611 = vrcp.f32 %v1334_v44  ;;  %v948_v1 = vpop.f32.mrf.mxu0 }
 0x20c   :  { %v2602_v0 = vpop.eup %2601  ;;  %2613 = vpow2.f32 %v2040_v4  ;;  %v2041_v53 = vmul.f32 -1.442695, %v1166_v47  ;;  %v3242_v26 = vadd.f32 %v3135_v62, %v947_v13  ;;  %v949_v15 = vadd.f32 %v948_v1, %v3085_v19 }
 0x20d   :  { %v1335_v36 = vadd.f32 1.0, %v2602_v0  ;;  %v952_v3 = vpop.f32.mrf.mxu0  ;;  %v1379_v39 = vmul.f32 %v3245_v8, %v2600_v6  ;;  %v3254_v0 = vld [vmem:[#allocation8 + $0x10] sm:$0xff] }
 0x20e   :  { %v1169_v17 = vadd.f32 %v3141_v31, %v949_v15  ;;  %v953_v51 = vadd.f32 %v952_v3, %v3089_v21 }
 0x20f   :  { %v2604_v41 = vpop.eup %2603  ;;  %2615 = vrcp.f32 %v1335_v36  ;;  %2441 = vmatmul.mubr.f32.vlgmr.msra.gmra.mxu1 %v1379_v39  ;;  %v954_v4 = vpop.f32.mrf.mxu0 }
 0x210   :  { %v2606_v44 = vpop.eup %2605  ;;  %2617 = vpow2.f32 %v2041_v53  ;;  %v2042_v54 = vmul.f32 -1.442695, %v1169_v17  ;;  %v3251_v47 = vadd.f32 %v3135_v62, %v953_v51  ;;  %v955_v19 = vadd.f32 %v954_v4, %v3093_v23 }
 0x211   :  { %v1336_v13 = vadd.f32 1.0, %v2606_v44  ;;  %v958_v1 = vpop.f32.mrf.mxu0  ;;  %v1380_v6 = vmul.f32 %v3254_v0, %v2604_v41  ;;  %v3263_v44 = vld [vmem:[#allocation8 + $0x18] sm:$0xff] }
 0x212   :  { %v1172_v21 = vadd.f32 %v3141_v31, %v955_v19  ;;  %v959_v15 = vadd.f32 %v958_v1, %v3097_v25 }
 0x213   :  { %v2608_v36 = vpop.eup %2607  ;;  %2619 = vrcp.f32 %v1336_v13  ;;  %2443 = vmatprep.mubr.f32.mxu1 %v1380_v6  ;;  %v960_v53 = vpop.f32.mrf.mxu0 }
 0x214   :  { %v2610_v3 = vpop.eup %2609  ;;  %2621 = vpow2.f32 %v2042_v54  ;;  %v2043_v39 = vmul.f32 -1.442695, %v1172_v21  ;;  %v3260_v17 = vadd.f32 %v3135_v62, %v959_v15  ;;  %v961_v23 = vadd.f32 %v960_v53, %v3101_v27  ;;  %v3272_v53 = vld [vmem:[#allocation8 + $0x20] sm:$0xff] }
 0x215   :  { %v1337_v51 = vadd.f32 1.0, %v2610_v3  ;;  %v964_v4 = vpop.f32.mrf.mxu0  ;;  %v1381_v41 = vmul.f32 %v3263_v44, %v2608_v36 }
 0x216   :  { %v1175_v25 = vadd.f32 %v3141_v31, %v961_v23  ;;  %v965_v19 = vadd.f32 %v964_v4, %v3105_v32 }
 0x217   :  { %2623 = vrcp.f32 %v1337_v51  ;;  %2444 = vmatmul.mubr.f32.gmra.mxu1 %v1381_v41  ;;  %v966_v13 = vpop.f32.mrf.mxu0 }
 0x218   :  { %v2612_v54 = vpop.eup %2611  ;;  %2625 = vpow2.f32 %v2043_v39  ;;  %v2044_v1 = vmul.f32 -1.442695, %v1175_v25  ;;  %v3269_v6 = vadd.f32 %v3135_v62, %v965_v19  ;;  %v967_v21 = vadd.f32 %v966_v13, %v3109_v34  ;;  %v3281_v13 = vld [vmem:[#allocation8 + $0x28] sm:$0xff] }
 0x219   :  { %v2614_v27 = vpop.eup %2613  ;;  %v970_v15 = vpop.f32.mrf.mxu0  ;;  %v1382_v36 = vmul.f32 %v3272_v53, %v2612_v54 }
 0x21a   :  { %v1338_v3 = vadd.f32 1.0, %v2614_v27  ;;  %v971_v32 = vadd.f32 %v970_v15, %v3113_v40  ;;  %2627 = vpow2.f32 %v2044_v1  ;;  %v1178_v23 = vadd.f32 %v3141_v31, %v967_v21 }
 0x21b   :  { %2446 = vmatprep.mubr.f32.mxu1 %v1382_v36  ;;  %v972_v39 = vpop.f32.mrf.mxu0 }
 0x21c   :  { %v2616_v51 = vpop.eup %2615  ;;  %2629 = vrcp.f32 %v1338_v3  ;;  %v3278_v4 = vadd.f32 %v3135_v62, %v971_v32  ;;  %v973_v34 = vadd.f32 %v972_v39, %v3117_v45  ;;  %v2045_v25 = vmul.f32 -1.442695, %v1178_v23  ;;  %v3290_v23 = vld [vmem:[#allocation8 + $0x30] sm:$0xff] }
 0x21d   :  { %v2618_v41 = vpop.eup %2617  ;;  %v976_v19 = vpop.f32.mrf.mxu0  ;;  %v1383_v54 = vmul.f32 %v3281_v13, %v2616_v51 }
 0x21e   :  { %v1339_v40 = vadd.f32 1.0, %v2618_v41  ;;  %v1181_v1 = vadd.f32 %v3141_v31, %v973_v34  ;;  %2631 = vpow2.f32 %v2045_v25  ;;  %v977_v27 = vadd.f32 %v976_v19, %v3123_v50  ;;  %v3294_v19 = vld [vmem:[#allocation8 + $0x38] sm:$0xff] }
 0x21f   :  { %2447 = vmatmul.mubr.f32.gmra.mxu1 %v1383_v54  ;;  %v978_v21 = vpop.f32.mrf.mxu0 }
 0x220   :  { %v2620_v15 = vpop.eup %2619  ;;  %2633 = vrcp.f32 %v1339_v40  ;;  %v2046_v36 = vmul.f32 -1.442695, %v1181_v1  ;;  %v979_v45 = vadd.f32 %v978_v21, %v3130_v57  ;;  %v3288_v32 = vadd.f32 %v3135_v62, %v977_v27  ;;  %v3297_v27 = vld [vmem:[#allocation8 + $0x40] sm:$0xff] }
 0x221   :  { %v2622_v3 = vpop.eup %2621  ;;  %v1384_v39 = vmul.f32 %v3290_v23, %v2620_v15 }
 0x222   :  { %v1340_v51 = vadd.f32 1.0, %v2622_v3  ;;  %v1184_v34 = vadd.f32 %v3141_v31, %v979_v45  ;;  %2635 = vpow2.f32 %v2046_v36  ;;  %v3300_v45 = vld [vmem:[#allocation8 + $0x48] sm:$0xff] }
 0x223   :  { %2449 = vmatprep.mubr.f32.mxu1 %v1384_v39 }
 0x224   :  { %v2624_v50 = vpop.eup %2623  ;;  %2637 = vrcp.f32 %v1340_v51  ;;  %v2047_v41 = vmul.f32 -1.442695, %v1184_v34 }
 0x225   :  { %v2626_v25 = vpop.eup %2625  ;;  %v1385_v57 = vmul.f32 %v3294_v19, %v2624_v50 }
 0x226   :  { %v1341_v54 = vadd.f32 1.0, %v2626_v25  ;;  %2639 = vpow2.f32 %v2047_v41 }
 0x227   :  { %2450 = vmatmul.mubr.f32.gmra.mxu1 %v1385_v57  ;;  %v2628_v62 = vpop.eup %2627 }
 0x228   :  { %2641 = vrcp.f32 %v1341_v54  ;;  %v1342_v1 = vadd.f32 1.0, %v2628_v62 }
 0x229   :  { %v2630_v40 = vpop.eup %2629 }
 0x22a   :  { %v1386_v31 = vmul.f32 %v3297_v27, %v2630_v40  ;;  %2643 = vrcp.f32 %v1342_v1 }
 0x22b   :  { %v2632_v21 = vpop.eup %2631 }
 0x22c   :  { %2452 = vmatprep.mubr.f32.mxu1 %v1386_v31  ;;  %v1343_v36 = vadd.f32 1.0, %v2632_v21 }
 0x22d   :  { %v2634_v15 = vpop.eup %2633 }
 0x22e   :  { %v1387_v3 = vmul.f32 %v3300_v45, %v2634_v15  ;;  %2645 = vrcp.f32 %v1343_v36 }
 0x22f   :  { %v2636_v39 = vpop.eup %2635 }
 0x230   :  { %2453 = vmatmul.mubr.f32.gmra.mxu1 %v1387_v3  ;;  %v1344_v34 = vadd.f32 1.0, %v2636_v39  ;;  %v491_v3 = vld [vmem:[#allocation9 + $0x5a0] sm:$0xff]  ;;  %v488_v39 = vld [vmem:[#allocation9 + $0x558] sm:$0xff] }
 0x231   :  { %v2638_v51 = vpop.eup %2637  ;;  %2470 = vmatprep.subr.mxu0 %v491_v3 }
 0x232   :  { %v1388_v50 = vmul.f32 %v2638_v51, %v2987_v42  ;;  %2647 = vrcp.f32 %v1344_v34  ;;  %2471 = vmatpush3.msra.mxu0 %v491_v3  ;;  %v484_v51 = vld [vmem:[#allocation9 + $0x4f8] sm:$0xff]  ;;  %v483_v34 = vld [vmem:[#allocation9 + $0x4e0] sm:$0xff]  ;;  %v501_v3 = vld [vmem:[#allocation9 + $0x690] sm:$0xff] }
 0x233   :  { %v2640_v41 = vpop.eup %2639 }
 0x234   :  { %2455 = vmatprep.mubr.f32.mxu1 %v1388_v50  ;;  %v1345_v57 = vadd.f32 1.0, %v2640_v41  ;;  %v482_v50 = vld [vmem:[#allocation9 + $0x4c8] sm:$0xff]  ;;  %v481_v41 = vld [vmem:[#allocation9 + $0x4b0] sm:$0xff] }
 0x235   :  { %v2642_v25 = vpop.eup %2641 }
 0x236   :  { %v1389_v54 = vmul.f32 %v2642_v25, %v2991_v49  ;;  %2649 = vrcp.f32 %v1345_v57  ;;  %v490_v49 = vld [vmem:[#allocation9 + $0x588] sm:$0xff]  ;;  %v480_v25 = vld [vmem:[#allocation9 + $0x498] sm:$0xff]  ;;  %v479_v57 = vld [vmem:[#allocation9 + $0x480] sm:$0xff] }
 0x237   :  { %v2644_v62 = vpop.eup %2643  ;;  %2472 = vmatprep.subr.mxu0 %v490_v49 }
 0x238   :  { %2456 = vmatmul.mubr.f32.gmra.mxu1 %v1389_v54  ;;  %v1390_v40 = vmul.f32 %v2644_v62, %v2995_v56  ;;  %2473 = vmatpush3.msra.mxu0 %v490_v49  ;;  %v489_v56 = vld [vmem:[#allocation9 + $0x570] sm:$0xff]  ;;  %v510_v54 = vld [vmem:[#allocation9 + $0x768] sm:$0xff]  ;;  %v500_v49 = vld [vmem:[#allocation9 + $0x678] sm:$0xff] }
 0x239   :  { %2474 = vmatprep.subr.mxu0 %v489_v56  ;;  %v509_v62 = vld [vmem:[#allocation9 + $0x750] sm:$0xff]  ;;  %2520 = vmatprep.subr.mxu1 %v510_v54 }
 0x23a   :  { %2458 = vmatprep.mubr.f32.mxu1 %v1390_v40  ;;  %2475 = vmatpush3.msra.mxu0 %v489_v56  ;;  %v508_v40 = vld [vmem:[#allocation9 + $0x738] sm:$0xff]  ;;  %v499_v56 = vld [vmem:[#allocation9 + $0x660] sm:$0xff] }
 0x23b   :  { %v2646_v1 = vpop.eup %2645  ;;  %2476 = vmatprep.subr.mxu0 %v488_v39  ;;  %2521 = vmatpush3.msra.mxu1 %v510_v54  ;;  %v1048_v54 = vadd.f32 %v3147_v46, %v3071_v12  ;;  %v1063_v12 = vadd.f32 %v3151_v33, %v3075_v14 }
 0x23c   :  { %v1391_v31 = vmul.f32 %v2646_v1, %v3001_v63  ;;  %2477 = vmatpush3.msra.mxu0 %v488_v39  ;;  %v487_v63 = vld [vmem:[#allocation9 + $0x540] sm:$0xff]  ;;  %2522 = vmatprep.subr.mxu1 %v509_v62  ;;  %v2017_v39 = vmul.f32 -1.442695, %v3154_v60 }
 0x23d   :  { %2478 = vmatprep.subr.mxu0 %v487_v63  ;;  %2523 = vmatpush3.msra.mxu1 %v509_v62  ;;  %v507_v1 = vld [vmem:[#allocation9 + $0x720] sm:$0xff]  ;;  %v2022_v62 = vmul.f32 -1.442695, %v3204_v2  ;;  %v1149_v2 = vadd.f32 %v3219_v5, %v1063_v12 }
 0x23e   :  { %2459 = vmatmul.mubr.f32.gmra.mxu1 %v1391_v31  ;;  %2479 = vmatpush3.msra.mxu0 %v487_v63  ;;  %v506_v31 = vld [vmem:[#allocation9 + $0x708] sm:$0xff]  ;;  %v2016_v63 = vmul.f32 -1.442695, %v3144_v48  ;;  %2651 = vpow2.f32 %v2017_v39  ;;  %v2020_v48 = vmul.f32 -1.442695, %v3184_v28  ;;  %v1073_v39 = vadd.f32 %v3161_v52, %v3083_v18  ;;  %v3534_v12 = vld [vmem:[#allocation18_spill] sm:$0xff] }
 0x23f   :  { %v2648_v21 = vpop.eup %2647  ;;  %2524 = vmatprep.subr.mxu1 %v508_v40  ;;  %v2027_v18 = vmul.f32 -1.442695, %v3251_v47 }
 0x240   :  { %v1392_v42 = vmul.f32 %v2648_v21, %v3007_v7  ;;  %v486_v7 = vld [vmem:[#allocation9 + $0x528] sm:$0xff]  ;;  %2525 = vmatpush3.msra.mxu1 %v508_v40  ;;  %v505_v21 = vld [vmem:[#allocation9 + $0x6f0] sm:$0xff]  ;;  %2653 = vpow2.f32 %v2016_v63 }
 0x241   :  { %2480 = vmatprep.subr.mxu0 %v486_v7  ;;  %2526 = vmatprep.subr.mxu1 %v507_v1 }
 0x242   :  { %2461 = vmatprep.mubr.f32.mxu1 %v1392_v42  ;;  %2481 = vmatpush3.msra.mxu0 %v486_v7  ;;  %v504_v42 = vld [vmem:[#allocation9 + $0x6d8] sm:$0xff]  ;;  %v498_v7 = vld [vmem:[#allocation9 + $0x648] sm:$0xff] }
 0x243   :  { %v2650_v15 = vpop.eup %2649  ;;  %2527 = vmatpush3.msra.mxu1 %v507_v1 }
 0x244   :  { %v1393_v36 = vmul.f32 %v2650_v15, %v3010_v10  ;;  %v485_v10 = vld [vmem:[#allocation9 + $0x510] sm:$0xff]  ;;  %2528 = vmatprep.subr.mxu1 %v506_v31  ;;  %v503_v15 = vld [vmem:[#allocation9 + $0x6c0] sm:$0xff] }
 0x245   :  { %2482 = vmatprep.subr.mxu0 %v485_v10  ;;  %2529 = vmatpush3.msra.mxu1 %v506_v31 }
 0x246   :  { %2462 = vmatmul.mubr.f32.gmra.mxu1 %v1393_v36  ;;  %2483 = vmatpush3.msra.mxu0 %v485_v10  ;;  %v502_v36 = vld [vmem:[#allocation9 + $0x6a8] sm:$0xff]  ;;  %v2019_v10 = vmul.f32 -1.442695, %v3174_v22  ;;  %v2023_v22 = vmul.f32 -1.442695, %v3214_v35 }
 0x247   :  { %2484 = vmatprep.subr.mxu0 %v484_v51  ;;  %2530 = vmatprep.subr.mxu1 %v505_v21 }
 0x248   :  { %2485 = vmatpush3.msra.mxu0 %v484_v51  ;;  %2531 = vmatpush3.msra.mxu1 %v505_v21  ;;  %v2018_v51 = vmul.f32 -1.442695, %v3164_v24  ;;  %2655 = vpow2.f32 %v2019_v10  ;;  %v1058_v21 = vadd.f32 %v3157_v29, %v3079_v16 }
 0x249   :  { %2486 = vmatprep.subr.mxu0 %v483_v34  ;;  %2532 = vmatprep.subr.mxu1 %v504_v42 }
 0x24a   :  { %2487 = vmatpush3.msra.mxu0 %v483_v34  ;;  %2533 = vmatpush3.msra.mxu1 %v504_v42  ;;  %2657 = vpow2.f32 %v2018_v51  ;;  %v2021_v34 = vmul.f32 -1.442695, %v3197_v58  ;;  %v1146_v14 = vadd.f32 %v3219_v5, %v1058_v21 }
 0x24b   :  { %2488 = vmatprep.subr.mxu0 %v482_v50  ;;  %2534 = vmatprep.subr.mxu1 %v503_v15  ;;  %v2652_v60 = vpop.eup %2651 }
 0x24c   :  { %2489 = vmatpush3.msra.mxu0 %v482_v50  ;;  %2535 = vmatpush3.msra.mxu1 %v503_v15  ;;  %2659 = vpow2.f32 %v2021_v34  ;;  %v2025_v15 = vmul.f32 -1.442695, %v3233_v61 }
 0x24d   :  { %2490 = vmatprep.subr.mxu0 %v481_v41  ;;  %2536 = vmatprep.subr.mxu1 %v502_v36  ;;  %v2654_v50 = vpop.eup %2653  ;;  %2661 = vpow2.f32 %v2020_v48 }
 0x24e   :  { %2491 = vmatpush3.msra.mxu0 %v481_v41  ;;  %2537 = vmatpush3.msra.mxu1 %v502_v36  ;;  %v1053_v41 = vadd.f32 %v3138_v30, %v3067_v9  ;;  %v1140_v9 = vadd.f32 %v3219_v5, %v1048_v54  ;;  %v3532_v54 = vld [vmem:[#allocation17_spill] sm:$0xff] }
 0x24f   :  { %2492 = vmatprep.subr.mxu0 %v480_v25  ;;  %2538 = vmatprep.subr.mxu1 %v501_v3 }
 0x250   :  { %2493 = vmatpush3.msra.mxu0 %v480_v25  ;;  %2539 = vmatpush3.msra.mxu1 %v501_v3  ;;  %v1235_v25 = vadd.f32 1.0, %v2652_v60  ;;  %v1143_v24 = vadd.f32 %v3219_v5, %v1053_v41 }
 0x251   :  { %2494 = vmatprep.subr.mxu0 %v479_v57  ;;  %2540 = vmatprep.subr.mxu1 %v500_v49 }
 0x252   :  { %2495 = vmatpush3.msra.mxu0 %v479_v57  ;;  %2541 = vmatpush3.msra.mxu1 %v500_v49  ;;  %v1234_v57 = vadd.f32 1.0, %v2654_v50  ;;  %2663 = vrcp.f32 %v1235_v25  ;;  %v2024_v49 = vmul.f32 -1.442695, %v3228_v59  ;;  %v1155_v59 = vadd.f32 %v3219_v5, %v1073_v39 }
 0x253   :  { %2542 = vmatprep.subr.mxu1 %v499_v56 }
 0x254   :  { %2543 = vmatpush3.msra.mxu1 %v499_v56  ;;  %2665 = vrcp.f32 %v1234_v57 }
 0x255   :  { %2544 = vmatprep.subr.mxu1 %v498_v7  ;;  %v2656_v58 = vpop.eup %2655  ;;  %2667 = vpow2.f32 %v2023_v22  ;;  %v3533_v22 = vld [vmem:[#allocation27_spill] sm:$0xff] }
 0x256   :  { %2545 = vmatpush3.msra.mxu1 %v498_v7  ;;  %v1237_v46 = vadd.f32 1.0, %v2656_v58  ;;  %v1068_v7 = vadd.f32 %v3167_v55, %v3087_v20 }
 0x257   :  { %v2658_v40 = vpop.eup %2657 }
 0x258   :  { %v1236_v31 = vadd.f32 1.0, %v2658_v40  ;;  %v1152_v50 = vadd.f32 %v3219_v5, %v1068_v7 }
 0x259   :  { %v2660_v42 = vpop.eup %2659 }
 0x25a   :  { %v2662_v33 = vpop.eup %2661  ;;  %v1239_v16 = vadd.f32 1.0, %v2660_v42 }
 0x25b   :  { %v1238_v10 = vadd.f32 1.0, %v2662_v33 }
 0x25f   :  { %v2664_v63 = vpop.eup %2663 }
 0x260   :  { %v1588_v34 = vsub.f32 1.0, %v2664_v63  ;;  %v1572_v25 = vmul.f32 %v3245_v8, %v2664_v63 }
 0x261   :  { %v2666_v61 = vpop.eup %2665 }
 0x262   :  { %v2668_v51 = vpop.eup %2667  ;;  %v1587_v48 = vsub.f32 1.0, %v2666_v61  ;;  %v1571_v47 = vmul.f32 %v3236_v11, %v2666_v61 }
 0x263   :  { %v1241_v58 = vadd.f32 1.0, %v2668_v51 }
 0x2cf   :  { %v2442_v28 = vpop.f32.mrf.mxu1 }
 0x2d0   :  { %v1540_v1 = vadd.f32 %v2442_v28, %v1143_v24  ;;  %v1083_v24 = vadd.f32 %v3533_v22, %v3532_v54 }
 0x2d1   :  { %v1460_v30 = vpop.f32.mrf.mxu1 }
 0x2d2   :  { %2669 = vtanh.f32 %v1540_v1  ;;  %v1539_v35 = vadd.f32 %v1460_v30, %v1140_v9  ;;  %v1161_v11 = vadd.f32 %v3219_v5, %v1083_v24 }
 0x2d3   :  { %2671 = vpow2.f32 %v2022_v62  ;;  %v2026_v62 = vmul.f32 -1.442695, %v3242_v26  ;;  %v2029_v26 = vmul.f32 -1.442695, %v3269_v6 }
 0x2d4   :  { %2673 = vtanh.f32 %v1539_v35 }
 0x2d5   :  { %2675 = vrcp.f32 %v1237_v46  ;;  %v3535_v46 = vld [vmem:[#allocation28_spill] sm:$0xff] }
 0x2d6   :  { %2677 = vrcp.f32 %v1236_v31  ;;  %v1078_v35 = vadd.f32 %v3535_v46, %v3534_v12 }
 0x2d7   :  { %v2445_v36 = vpop.f32.mrf.mxu1 }
 0x2d8   :  { %v1542_v3 = vadd.f32 %v2445_v36, %v1149_v2  ;;  %v2028_v36 = vmul.f32 -1.442695, %v3260_v17 }
 0x2d9   :  { %v1470_v56 = vpop.f32.mrf.mxu1 }
 0x2da   :  { %2679 = vtanh.f32 %v1542_v3  ;;  %v1541_v29 = vadd.f32 %v1470_v56, %v1146_v14  ;;  %v1158_v14 = vadd.f32 %v3219_v5, %v1078_v35 }
 0x2db   :  { %2681 = vpow2.f32 %v2025_v15 }
 0x2dc   :  { %2683 = vtanh.f32 %v1541_v29 }
 0x2dd   :  { %2685 = vpow2.f32 %v2024_v49 }
 0x2de   :  { %2687 = vrcp.f32 %v1239_v16 }
 0x2df   :  { %v2670_v60 = vpop.eup %2669  ;;  %v2448_v52 = vpop.f32.mrf.mxu1  ;;  %2689 = vrcp.f32 %v1238_v10 }
 0x2e0   :  { %v2672_v41 = vpop.eup %2671  ;;  %v1604_v20 = vmul.f32 %v2670_v60, %v1588_v34  ;;  %v1544_v55 = vadd.f32 %v2448_v52, %v1155_v59  ;;  %v3536_v59 = vld [vmem:[#allocation19_spill] sm:$0xff]  ;;  %v3537_v60 = vld [vmem:[#allocation29_spill] sm:$0xff] }
 0x2e1   :  { %v2674_v57 = vpop.eup %2673  ;;  %v1480_v28 = vpop.f32.mrf.mxu1  ;;  %v1240_v31 = vadd.f32 1.0, %v2672_v41  ;;  %v3539_v41 = vld [vmem:[#allocation30_spill] sm:$0xff] }
 0x2e2   :  { %2691 = vtanh.f32 %v1544_v55  ;;  %v1543_v40 = vadd.f32 %v1480_v28, %v1152_v50  ;;  %v1603_v1 = vmul.f32 %v2674_v57, %v1587_v48  ;;  %v3343_v9 = vadd.f32 %v1604_v20, %v1572_v25  ;;  %v2676_v30 = vpop.eup %2675  ;;  %v3538_v48 = vld [vmem:[#allocation20_spill] sm:$0xff] }
 0x2e3   :  { %2693 = vpow2.f32 %v2027_v18  ;;  %v2678_v8 = vpop.eup %2677  ;;  %v1590_v42 = vsub.f32 1.0, %v2676_v30  ;;  %v1574_v6 = vmul.f32 %v3263_v44, %v2676_v30  ;;  %v1093_v18 = vadd.f32 %v3537_v60, %v3536_v59  ;;  %v3544_v59 = vld [vmem:[#allocation32_spill] sm:$0xff] }
 0x2e4   :  { %2695 = vtanh.f32 %v1543_v40  ;;  %v3347_v21 = vadd.f32 %v1603_v1, %v1571_v47  ;;  %v1636_v33 = vmax.f32 %v3343_v9, 0.0  ;;  %v1589_v49 = vsub.f32 1.0, %v2678_v8 }
 0x2e5   :  { %2697 = vpow2.f32 %v2026_v62  ;;  %v1573_v7 = vmul.f32 %v3254_v0, %v2678_v8  ;;  %v1088_v20 = vadd.f32 %v3539_v41, %v3538_v48  ;;  %v2031_v55 = vmul.f32 -1.442695, %v3288_v32 }
 0x2e6   :  { %2699 = vrcp.f32 %v1241_v58  ;;  %v1635_v2 = vmax.f32 %v3347_v21, 0.0  ;;  %v1167_v22 = vadd.f32 %v3219_v5, %v1093_v18  ;;  %v2030_v62 = vmul.f32 -1.442695, %v3278_v4 }
 0x2e7   :  { %v2680_v15 = vpop.eup %2679  ;;  %v2451_v3 = vpop.f32.mrf.mxu1  ;;  %2701 = vrcp.f32 %v1240_v31  ;;  %v1164_v12 = vadd.f32 %v3219_v5, %v1088_v20 }
 0x2e8   :  { %v2682_v56 = vpop.eup %2681  ;;  %v1546_v39 = vadd.f32 %v2451_v3, %v1161_v11  ;;  %2496 = vmatprep.mubr.f32.mxu0 %v1635_v2  ;;  %v1606_v16 = vmul.f32 %v2680_v15, %v1590_v42  ;;  %2703 = vpow2.f32 %v2029_v26  ;;  %v3540_v11 = vld [vmem:[#allocation21_spill] sm:$0xff]  ;;  %v3541_v2 = vld [vmem:[#allocation31_spill] sm:$0xff] }
 0x2e9   :  { %v2684_v29 = vpop.eup %2683  ;;  %v1490_v63 = vpop.f32.mrf.mxu1  ;;  %2497 = vmatmul.mubr.f32.vlgmr.msra.gmra.mxu0 %v1636_v33  ;;  %v1243_v52 = vadd.f32 1.0, %v2682_v56  ;;  %v1103_v42 = vadd.f32 %v3541_v2, %v3540_v11  ;;  %v3547_v2 = vld [vmem:[#allocation26_spill] sm:$0xff] }
 0x2ea   :  { %v2686_v17 = vpop.eup %2685  ;;  %2705 = vtanh.f32 %v1546_v39  ;;  %v1545_v61 = vadd.f32 %v1490_v63, %v1158_v14  ;;  %v1605_v10 = vmul.f32 %v2684_v29, %v1589_v49  ;;  %v3357_v51 = vadd.f32 %v1606_v16, %v1574_v6  ;;  %v3542_v14 = vld [vmem:[#allocation22_spill] sm:$0xff] }
 0x2eb   :  { %v2688_v34 = vpop.eup %2687  ;;  %2707 = vpow2.f32 %v2028_v36  ;;  %v1242_v0 = vadd.f32 1.0, %v2686_v17  ;;  %v1098_v33 = vadd.f32 %v3194_v43, %v3542_v14  ;;  %v1173_v16 = vadd.f32 %v3219_v5, %v1103_v42 }
 0x2ec   :  { %2709 = vtanh.f32 %v1545_v61  ;;  %v3361_v44 = vadd.f32 %v1605_v10, %v1573_v7  ;;  %v2690_v50 = vpop.eup %2689  ;;  %v1592_v57 = vsub.f32 1.0, %v2688_v34  ;;  %v1638_v24 = vmax.f32 %v3357_v51, 0.0 }
 0x2ed   :  { %2711 = vrcp.f32 %v1243_v52  ;;  %v1591_v47 = vsub.f32 1.0, %v2690_v50  ;;  %v1576_v40 = vmul.f32 %v3281_v13, %v2688_v34  ;;  %v1575_v8 = vmul.f32 %v3272_v53, %v2690_v50  ;;  %v3543_v34 = vld [vmem:[#allocation23_spill] sm:$0xff] }
 0x2ee   :  { %v1637_v25 = vmax.f32 %v3361_v44, 0.0  ;;  %2713 = vrcp.f32 %v1242_v0  ;;  %v1113_v60 = vadd.f32 %v3544_v59, %v3543_v34  ;;  %v1170_v52 = vadd.f32 %v3219_v5, %v1098_v33 }
 0x2ef   :  { %v2692_v54 = vpop.eup %2691  ;;  %2715 = vpow2.f32 %v2031_v55  ;;  %v1123_v42 = vadd.f32 %v3210_v37, %v3547_v2 }
 0x2f0   :  { %v2694_v58 = vpop.eup %2693  ;;  %v2454_v28 = vpop.f32.mrf.mxu1  ;;  %2499 = vmatprep.mubr.f32.mxu0 %v1637_v25  ;;  %v1608_v1 = vmul.f32 %v2692_v54, %v1592_v57  ;;  %v3545_v25 = vld [vmem:[#allocation24_spill] sm:$0xff]  ;;  %v3546_v57 = vld [vmem:[#allocation33_spill] sm:$0xff] }
 0x2f1   :  { %v2696_v30 = vpop.eup %2695  ;;  %v1548_v32 = vadd.f32 %v2454_v28, %v1167_v22  ;;  %2500 = vmatmul.mubr.f32.gmra.mxu0 %v1638_v24  ;;  %v1245_v13 = vadd.f32 1.0, %v2694_v58  ;;  %v1108_v54 = vadd.f32 %v3546_v57, %v3545_v25 }
 0x2f2   :  { %v2698_v46 = vpop.eup %2697  ;;  %v1500_v35 = vpop.f32.mrf.mxu1  ;;  %v1607_v31 = vmul.f32 %v2696_v30, %v1591_v47  ;;  %v3373_v26 = vadd.f32 %v1608_v1, %v1576_v40 }
 0x2f3   :  { %v2700_v4 = vpop.eup %2699  ;;  %2717 = vtanh.f32 %v1548_v32  ;;  %v1547_v15 = vadd.f32 %v1500_v35, %v1164_v12  ;;  %v1244_v49 = vadd.f32 1.0, %v2698_v46  ;;  %v1176_v12 = vadd.f32 %v3219_v5, %v1108_v54  ;;  %v2759_v54 = vld [vmem:[#allocation8 + $0x68] sm:$0xff] }
 0x2f4   :  { %2719 = vpow2.f32 %v2030_v62  ;;  %v3377_v36 = vadd.f32 %v1607_v31, %v1575_v8  ;;  %v2702_v3 = vpop.eup %2701  ;;  %v1594_v39 = vsub.f32 1.0, %v2700_v4  ;;  %v1640_v29 = vmax.f32 %v3373_v26, 0.0 }
 0x2f5   :  { %2721 = vtanh.f32 %v1547_v15  ;;  %v2704_v53 = vpop.eup %2703  ;;  %v1593_v17 = vsub.f32 1.0, %v2702_v3  ;;  %v1578_v61 = vmul.f32 %v3294_v19, %v2700_v4  ;;  %v1577_v41 = vmul.f32 %v3290_v23, %v2702_v3 }
 0x2f6   :  { %v1639_v56 = vmax.f32 %v3377_v36, 0.0  ;;  %2723 = vrcp.f32 %v1245_v13  ;;  %v1247_v50 = vadd.f32 1.0, %v2704_v53  ;;  %v1179_v62 = vadd.f32 %v3219_v5, %v1113_v60  ;;  %v2758_v60 = vld [vmem:[#allocation8 + $0x50] sm:$0xff] }
 0x2f7   :  { %v2706_v6 = vpop.eup %2705  ;;  %2725 = vrcp.f32 %v1244_v49 }
 0x2f8   :  { %v2708_v63 = vpop.eup %2707  ;;  %v2457_v7 = vpop.f32.mrf.mxu1  ;;  %2502 = vmatprep.mubr.f32.mxu0 %v1639_v56  ;;  %v1610_v10 = vmul.f32 %v2706_v6, %v1594_v39 }
 0x2f9   :  { %v2710_v43 = vpop.eup %2709  ;;  %v1550_v18 = vadd.f32 %v2457_v7, %v1173_v16  ;;  %2503 = vmatmul.mubr.f32.gmra.mxu0 %v1640_v29  ;;  %v1246_v22 = vadd.f32 1.0, %v2708_v63 }
 0x2fa   :  { %v1510_v48 = vpop.f32.mrf.mxu1  ;;  %v1609_v20 = vmul.f32 %v2710_v43, %v1593_v17  ;;  %v3389_v0 = vadd.f32 %v1610_v10, %v1578_v61  ;;  %v2712_v19 = vpop.eup %2711  ;;  %v2757_v61 = vld [vmem:[#allocation8 + $0x58] sm:$0xff] }
 0x2fb   :  { %2727 = vtanh.f32 %v1550_v18  ;;  %v1549_v55 = vadd.f32 %v1510_v48, %v1170_v52  ;;  %v2714_v58 = vpop.eup %2713  ;;  %v1596_v1 = vsub.f32 1.0, %v2712_v19  ;;  %v1580_v31 = vmul.f32 %v3300_v45, %v2712_v19 }
 0x2fc   :  { %v3393_v24 = vadd.f32 %v1609_v20, %v1577_v41  ;;  %v2716_v23 = vpop.eup %2715  ;;  %v1642_v40 = vmax.f32 %v3389_v0, 0.0  ;;  %v1595_v8 = vsub.f32 1.0, %v2714_v58  ;;  %v1579_v3 = vmul.f32 %v3297_v27, %v2714_v58 }
 0x2fd   :  { %2729 = vtanh.f32 %v1549_v55  ;;  %v1249_v13 = vadd.f32 1.0, %v2716_v23  ;;  %v1185_v45 = vadd.f32 %v3219_v5, %v1123_v42  ;;  %v2762_v42 = vld [vmem:[#allocation8 + $0x70] sm:$0xff] }
 0x2fe   :  { %2731 = vrcp.f32 %v1247_v50  ;;  %v1641_v28 = vmax.f32 %v3393_v24, 0.0  ;;  %v2460_v47 = vpop.f32.mrf.mxu1 }
 0x2ff   :  { %2733 = vrcp.f32 %v1246_v22  ;;  %v1552_v32 = vadd.f32 %v2460_v47, %v1179_v62  ;;  %v2760_v62 = vld [vmem:[#allocation8 + $0x60] sm:$0xff] }
 0x300   :  { %v2718_v30 = vpop.eup %2717  ;;  %2505 = vmatprep.mubr.f32.mxu0 %v1641_v28  ;;  %v1520_v35 = vpop.f32.mrf.mxu1 }
 0x301   :  { %v2720_v46 = vpop.eup %2719  ;;  %2506 = vmatmul.mubr.f32.gmra.mxu0 %v1642_v40  ;;  %v1612_v4 = vmul.f32 %v2718_v30, %v1596_v1  ;;  %2735 = vtanh.f32 %v1552_v32  ;;  %v1551_v15 = vadd.f32 %v1520_v35, %v1176_v12 }
 0x302   :  { %v2722_v11 = vpop.eup %2721  ;;  %v1248_v53 = vadd.f32 1.0, %v2720_v46 }
 0x303   :  { %v1611_v14 = vmul.f32 %v2722_v11, %v1595_v8  ;;  %v3403_v33 = vadd.f32 %v1612_v4, %v1580_v31  ;;  %v2724_v49 = vpop.eup %2723  ;;  %2737 = vtanh.f32 %v1551_v15  ;;  %v2761_v31 = vld [vmem:[#allocation8 + $0x78] sm:$0xff] }
 0x304   :  { %v2726_v39 = vpop.eup %2725  ;;  %2739 = vrcp.f32 %v1249_v13  ;;  %v1598_v16 = vsub.f32 1.0, %v2724_v49  ;;  %v1582_v10 = vmul.f32 %v2757_v61, %v2724_v49 }
 0x305   :  { %v3405_v56 = vadd.f32 %v1611_v14, %v1579_v3  ;;  %2741 = vrcp.f32 %v1248_v53  ;;  %v1644_v27 = vmax.f32 %v3403_v33, 0.0  ;;  %v1597_v17 = vsub.f32 1.0, %v2726_v39 }
 0x306   :  { %v2463_v6 = vpop.f32.mrf.mxu1  ;;  %v1581_v18 = vmul.f32 %v2758_v60, %v2726_v39  ;;  %v497_v39 = vld [vmem:[#allocation9 + $0x630] sm:$0xff] }
 0x307   :  { %v1643_v37 = vmax.f32 %v3405_v56, 0.0  ;;  %v1554_v63 = vadd.f32 %v2463_v6, %v1185_v45  ;;  %2546 = vmatprep.subr.mxu1 %v497_v39  ;;  %v496_v45 = vld [vmem:[#allocation9 + $0x618] sm:$0xff]  ;;  %v495_v6 = vld [vmem:[#allocation9 + $0x600] sm:$0xff] }
 0x308   :  { %v2728_v29 = vpop.eup %2727  ;;  %v1530_v7 = vpop.f32.mrf.mxu1  ;;  %2547 = vmatpush3.msra.mxu1 %v497_v39 }
 0x309   :  { %2508 = vmatprep.mubr.f32.mxu0 %v1643_v37  ;;  %v1614_v43 = vmul.f32 %v2728_v29, %v1598_v16  ;;  %2743 = vtanh.f32 %v1554_v63  ;;  %v1553_v59 = vadd.f32 %v1530_v7, %v3224_v38  ;;  %2548 = vmatprep.subr.mxu1 %v496_v45  ;;  %v3548_v37 = vld [vmem:[#allocation25_spill] sm:$0xff]  ;;  %v2763_v29 = vld [vmem:[#allocation11] sm:$0xff] }
 0x30a   :  { %v2730_v34 = vpop.eup %2729  ;;  %2509 = vmatmul.mubr.f32.gmra.mxu0 %v1644_v27  ;;  %2549 = vmatpush3.msra.mxu1 %v496_v45  ;;  %v1653_v16 = vsub.s32 1, %v3548_v37 }
 0x30b   :  { %v2732_v5 = vpop.eup %2731  ;;  %v1613_v52 = vmul.f32 %v2730_v34, %v1597_v17  ;;  %v3411_v50 = vadd.f32 %v1614_v43, %v1582_v10  ;;  %2745 = vtanh.f32 %v1553_v59  ;;  %2550 = vmatprep.subr.mxu1 %v495_v6 }
 0x30c   :  { %v2734_v48 = vpop.eup %2733  ;;  %v1600_v20 = vsub.f32 1.0, %v2732_v5  ;;  %v1584_v38 = vmul.f32 %v2759_v54, %v2732_v5  ;;  %2551 = vmatpush3.msra.mxu1 %v495_v6  ;;  %v1654_v63 = vrot.slane %v2763_v29, %v1653_v16 }
 0x30d   :  { %v3413_v41 = vadd.f32 %v1613_v52, %v1581_v18  ;;  %v1646_v25 = vmax.f32 %v3411_v50, 0.0  ;;  %v1599_v57 = vsub.f32 1.0, %v2734_v48  ;;  %v1583_v28 = vmul.f32 %v2760_v62, %v2734_v48 }
 0x30e   :  { %v2736_v55 = vpop.eup %2735 }
 0x30f   :  { %v1645_v19 = vmax.f32 %v3413_v41, 0.0  ;;  %v1616_v22 = vmul.f32 %v2736_v55, %v1600_v20 }
 0x310   :  { %v2738_v58 = vpop.eup %2737 }
 0x311   :  { %2511 = vmatprep.mubr.f32.mxu0 %v1645_v19  ;;  %v1615_v23 = vmul.f32 %v2738_v58, %v1599_v57  ;;  %v3417_v47 = vadd.f32 %v1616_v22, %v1584_v38  ;;  %v2740_v40 = vpop.eup %2739 }
 0x312   :  { %2512 = vmatmul.mubr.f32.gmra.mxu0 %v1646_v25  ;;  %v2742_v30 = vpop.eup %2741  ;;  %v1602_v12 = vsub.f32 1.0, %v2740_v40  ;;  %v1586_v4 = vmul.f32 %v2761_v31, %v2740_v40  ;;  %v1802_v31 = vsub.s32 2, %v3548_v37 }
 0x313   :  { %v3419_v1 = vadd.f32 %v1615_v23, %v1583_v28  ;;  %v1648_v35 = vmax.f32 %v3417_v47, 0.0  ;;  %v1601_v8 = vsub.f32 1.0, %v2742_v30  ;;  %v1585_v13 = vmul.f32 %v2762_v42, %v2742_v30 }
 0x315   :  { %v1647_v32 = vmax.f32 %v3419_v1, 0.0 }
 0x316   :  { %v2744_v46 = vpop.eup %2743 }
 0x317   :  { %2514 = vmatprep.mubr.f32.mxu0 %v1647_v32  ;;  %v1618_v11 = vmul.f32 %v2744_v46, %v1602_v12 }
 0x318   :  { %v2746_v2 = vpop.eup %2745  ;;  %2515 = vmatmul.mubr.f32.gmra.mxu0 %v1648_v35 }
 0x319   :  { %v1617_v15 = vmul.f32 %v2746_v2, %v1601_v8  ;;  %v3423_v3 = vadd.f32 %v1618_v11, %v1586_v4  ;;  %v3458_v4 = vrot.slane %v2763_v29, %v1802_v31 }
 0x31b   :  { %v3425_v14 = vadd.f32 %v1617_v15, %v1585_v13  ;;  %v1650_v53 = vmax.f32 %v3423_v3, 0.0 }
 0x31d   :  { %v1649_v49 = vmax.f32 %v3425_v14, 0.0 }
 0x31f   :  { %2517 = vmatprep.mubr.f32.mxu0 %v1649_v49 }
 0x320   :  { %2518 = vmatmul.mubr.f32.gmra.mxu0 %v1650_v53 }
 0x3a9   :  { %v2498_v27 = vpop.f32.mrf.mxu0 }
 0x3aa   :  { %v1727_v61 = vadd.f32 %v2498_v27, %v1654_v63 }
 0x3ab   :  { %v1721_v7 = vpop.f32.mrf.mxu0 }
 0x3ac   :  { %v1722_v17 = vadd.f32 %v1721_v7, %v1654_v63  ;;  %v1950_v2 = vadd.f32 %v1727_v61, %v3343_v9 }
 0x3ae   :  { %2552 = vmatprep.mubr.f32.mxu1 %v1722_v17  ;;  %v1949_v15 = vadd.f32 %v1722_v17, %v3347_v21 }
 0x3af   :  { %2553 = vmatmul.mubr.f32.vlgmr.msra.gmra.mxu1 %v1727_v61 }
 0x3b1   :  { %v2501_v10 = vpop.f32.mrf.mxu0 }
 0x3b2   :  { %v1737_v59 = vadd.f32 %v2501_v10, %v1654_v63 }
 0x3b3   :  { %v1731_v43 = vpop.f32.mrf.mxu0 }
 0x3b4   :  { %v1732_v34 = vadd.f32 %v1731_v43, %v1654_v63  ;;  %v1952_v6 = vadd.f32 %v1737_v59, %v3357_v51 }
 0x3b6   :  { %2555 = vmatprep.mubr.f32.mxu1 %v1732_v34  ;;  %v1951_v29 = vadd.f32 %v1732_v34, %v3361_v44 }
 0x3b7   :  { %2556 = vmatmul.mubr.f32.gmra.mxu1 %v1737_v59 }
 0x3b9   :  { %v2504_v5 = vpop.f32.mrf.mxu0 }
 0x3ba   :  { %v1747_v52 = vadd.f32 %v2504_v5, %v1654_v63 }
 0x3bb   :  { %v1741_v60 = vpop.f32.mrf.mxu0 }
 0x3bc   :  { %v1742_v18 = vadd.f32 %v1741_v60, %v1654_v63  ;;  %v1954_v7 = vadd.f32 %v1747_v52, %v3373_v26 }
 0x3be   :  { %2558 = vmatprep.mubr.f32.mxu1 %v1742_v18  ;;  %v1953_v10 = vadd.f32 %v1742_v18, %v3377_v36 }
 0x3bf   :  { %2559 = vmatmul.mubr.f32.gmra.mxu1 %v1747_v52 }
 0x3c1   :  { %v2507_v48 = vpop.f32.mrf.mxu0 }
 0x3c2   :  { %v1757_v19 = vadd.f32 %v2507_v48, %v1654_v63 }
 0x3c3   :  { %v1751_v20 = vpop.f32.mrf.mxu0 }
 0x3c4   :  { %v3430_v55 = vadd.f32 %v1751_v20, %v1654_v63  ;;  %v1956_v34 = vadd.f32 %v1757_v19, %v3389_v0 }
 0x3c6   :  { %2561 = vmatprep.mubr.f32.mxu1 %v3430_v55  ;;  %v1955_v26 = vadd.f32 %v3430_v55, %v3393_v24 }
 0x3c7   :  { %2562 = vmatmul.mubr.f32.gmra.mxu1 %v1757_v19 }
 0x3ca   :  { %v2510_v25 = vpop.f32.mrf.mxu0 }
 0x3cb   :  { %v3435_v38 = vadd.f32 %v2510_v25, %v1654_v63 }
 0x3cc   :  { %v1761_v57 = vpop.f32.mrf.mxu0 }
 0x3cd   :  { %v3433_v54 = vadd.f32 %v1761_v57, %v1654_v63  ;;  %v1958_v20 = vadd.f32 %v3435_v38, %v3403_v33 }
 0x3cf   :  { %2564 = vmatprep.mubr.f32.mxu1 %v3433_v54  ;;  %v1957_v0 = vadd.f32 %v3433_v54, %v3405_v56 }
 0x3d0   :  { %2565 = vmatmul.mubr.f32.gmra.mxu1 %v3435_v38 }
 0x3d2   :  { %v2513_v22 = vpop.f32.mrf.mxu0 }
 0x3d3   :  { %v3441_v28 = vadd.f32 %v2513_v22, %v1654_v63 }
 0x3d4   :  { %v1771_v58 = vpop.f32.mrf.mxu0 }
 0x3d5   :  { %v3439_v62 = vadd.f32 %v1771_v58, %v1654_v63  ;;  %v1960_v58 = vadd.f32 %v3441_v28, %v3411_v50 }
 0x3d7   :  { %2567 = vmatprep.mubr.f32.mxu1 %v3439_v62  ;;  %v1959_v33 = vadd.f32 %v3439_v62, %v3413_v41 }
 0x3d8   :  { %2568 = vmatmul.mubr.f32.gmra.mxu1 %v3441_v28  ;;  %v2516_v23 = vpop.f32.mrf.mxu0 }
 0x3d9   :  { %v3447_v32 = vadd.f32 %v2516_v23, %v1654_v63 }
 0x3da   :  { %v1781_v40 = vpop.f32.mrf.mxu0 }
 0x3db   :  { %v3445_v30 = vadd.f32 %v1781_v40, %v1654_v63 }
 0x3dd   :  { %2570 = vmatprep.mubr.f32.mxu1 %v3445_v30  ;;  %v1961_v50 = vadd.f32 %v3445_v30, %v3419_v1 }
 0x3de   :  { %2571 = vmatmul.mubr.f32.gmra.mxu1 %v3447_v32 }
 0x3e0   :  { %v2519_v12 = vpop.f32.mrf.mxu0 }
 0x3e1   :  { %v3453_v8 = vadd.f32 %v2519_v12, %v1654_v63 }
 0x3e2   :  { %v1791_v46 = vpop.f32.mrf.mxu0 }
 0x3e3   :  { %v3451_v35 = vadd.f32 %v1791_v46, %v1654_v63  ;;  %v1962_v46 = vadd.f32 %v3447_v32, %v3417_v47 }
 0x3e5   :  { %2573 = vmatprep.mubr.f32.mxu1 %v3451_v35  ;;  %v1963_v47 = vadd.f32 %v3451_v35, %v3425_v14 }
 0x3e6   :  { %2574 = vmatmul.mubr.f32.gmra.mxu1 %v3453_v8 }
 0x46f   :  { %v2554_v11 = vpop.f32.mrf.mxu1 }
 0x470   :  { %v1876_v42 = vadd.f32 %v2554_v11, %v3458_v4 }
 0x471   :  { %v1870_v13 = vpop.f32.mrf.mxu1 }
 0x472   :  { %v1966_v49 = vadd.f32 %v1950_v2, %v1876_v42  ;;  %v1871_v53 = vadd.f32 %v1870_v13, %v3458_v4  ;;  %v1964_v42 = vadd.f32 %v3453_v8, %v3423_v3 }
 0x474   :  { %1982 = vst [vmem:[#allocation12 + $0x8] sm:$0xff] %v1966_v49  ;;  %v1965_v39 = vadd.f32 %v1949_v15, %v1871_v53 }
 0x476   :  { %1981 = vst [vmem:[#allocation12] sm:$0xff] %v1965_v39 }
 0x477   :  { %v2557_v45 = vpop.f32.mrf.mxu1 }
 0x478   :  { %v1886_v37 = vadd.f32 %v2557_v45, %v3458_v4 }
 0x479   :  { %v1880_v16 = vpop.f32.mrf.mxu1 }
 0x47a   :  { %v1968_v9 = vadd.f32 %v1952_v6, %v1886_v37  ;;  %v1881_v63 = vadd.f32 %v1880_v16, %v3458_v4 }
 0x47c   :  { %1984 = vst [vmem:[#allocation12 + $0x18] sm:$0xff] %v1968_v9  ;;  %v1967_v27 = vadd.f32 %v1951_v29, %v1881_v63 }
 0x47e   :  { %1983 = vst [vmem:[#allocation12 + $0x10] sm:$0xff] %v1967_v27 }
 0x47f   :  { %v2560_v21 = vpop.f32.mrf.mxu1 }
 0x480   :  { %v1896_v17 = vadd.f32 %v2560_v21, %v3458_v4 }
 0x481   :  { %v1890_v61 = vpop.f32.mrf.mxu1 }
 0x482   :  { %v1970_v51 = vadd.f32 %v1954_v7, %v1896_v17  ;;  %v1891_v43 = vadd.f32 %v1890_v61, %v3458_v4 }
 0x484   :  { %1986 = vst [vmem:[#allocation12 + $0x28] sm:$0xff] %v1970_v51  ;;  %v1969_v59 = vadd.f32 %v1953_v10, %v1891_v43 }
 0x486   :  { %1985 = vst [vmem:[#allocation12 + $0x20] sm:$0xff] %v1969_v59 }
 0x487   :  { %v2563_v44 = vpop.f32.mrf.mxu1 }
 0x488   :  { %v1906_v5 = vadd.f32 %v2563_v44, %v3458_v4 }
 0x489   :  { %v1900_v60 = vpop.f32.mrf.mxu1 }
 0x48a   :  { %v1972_v52 = vadd.f32 %v1956_v34, %v1906_v5  ;;  %v1901_v48 = vadd.f32 %v1900_v60, %v3458_v4 }
 0x48c   :  { %1988 = vst [vmem:[#allocation12 + $0x38] sm:$0xff] %v1972_v52  ;;  %v1971_v36 = vadd.f32 %v1955_v26, %v1901_v48 }
 0x48e   :  { %1987 = vst [vmem:[#allocation12 + $0x30] sm:$0xff] %v1971_v36 }
 0x490   :  { %v2566_v18 = vpop.f32.mrf.mxu1 }
 0x491   :  { %v1916_v25 = vadd.f32 %v2566_v18, %v3458_v4 }
 0x492   :  { %v1910_v57 = vpop.f32.mrf.mxu1 }
 0x493   :  { %v1974_v19 = vadd.f32 %v1958_v20, %v1916_v25  ;;  %v1911_v22 = vadd.f32 %v1910_v57, %v3458_v4 }
 0x495   :  { %1990 = vst [vmem:[#allocation12 + $0x48] sm:$0xff] %v1974_v19  ;;  %v1973_v24 = vadd.f32 %v1957_v0, %v1911_v22 }
 0x497   :  { %1989 = vst [vmem:[#allocation12 + $0x40] sm:$0xff] %v1973_v24 }
 0x498   :  { %v2569_v55 = vpop.f32.mrf.mxu1 }
 0x499   :  { %v1926_v23 = vadd.f32 %v2569_v55, %v3458_v4 }
 0x49a   :  { %v1920_v40 = vpop.f32.mrf.mxu1 }
 0x49b   :  { %v1976_v38 = vadd.f32 %v1960_v58, %v1926_v23  ;;  %v1921_v12 = vadd.f32 %v1920_v40, %v3458_v4 }
 0x49d   :  { %1992 = vst [vmem:[#allocation12 + $0x58] sm:$0xff] %v1976_v38  ;;  %v1975_v56 = vadd.f32 %v1959_v33, %v1921_v12 }
 0x49e   :  { %v2572_v54 = vpop.f32.mrf.mxu1 }
 0x49f   :  { %1991 = vst [vmem:[#allocation12 + $0x50] sm:$0xff] %v1975_v56  ;;  %v1936_v31 = vadd.f32 %v2572_v54, %v3458_v4 }
 0x4a0   :  { %v1930_v11 = vpop.f32.mrf.mxu1 }
 0x4a1   :  { %v1978_v28 = vadd.f32 %v1962_v46, %v1936_v31  ;;  %v1931_v2 = vadd.f32 %v1930_v11, %v3458_v4 }
 0x4a3   :  { %1994 = vst [vmem:[#allocation12 + $0x68] sm:$0xff] %v1978_v28  ;;  %v1977_v41 = vadd.f32 %v1961_v50, %v1931_v2 }
 0x4a5   :  { %1993 = vst [vmem:[#allocation12 + $0x60] sm:$0xff] %v1977_v41 }
 0x4a6   :  { %v2575_v62 = vpop.f32.mrf.mxu1 }
 0x4a7   :  { %v1946_v13 = vadd.f32 %v2575_v62, %v3458_v4 }
 0x4a8   :  { %v1940_v15 = vpop.f32.mrf.mxu1 }
 0x4a9   :  { %v1980_v32 = vadd.f32 %v1964_v42, %v1946_v13  ;;  %v1941_v1 = vadd.f32 %v1940_v15, %v3458_v4 }
 0x4ab   :  { %1996 = vst [vmem:[#allocation12 + $0x78] sm:$0xff] %v1980_v32  ;;  %v1979_v30 = vadd.f32 %v1963_v47, %v1941_v1 }
 0x4ad   :  { %1995 = vst [vmem:[#allocation12 + $0x70] sm:$0xff] %v1979_v30 }
 0x4ae   :  { %2875 = shalt.err (!%p2872_p1)
}
 0x4af   :  { %2008 = dma.vmem_to_hbm [thread:$0]  %s2003_s4, 2048, %s3512_s5, [#allocation5], %s2894_s23, %s2894_s23, %s2895_s24  }
 0x4b0   :  { %2890 = dma.done.wait [#allocation5], 2048  }
 0x4b1   :  { %2891 = vsyncadd [#allocation5], 4294965248 }
 0x4b2   :  { %2012 = vsyncpa [#allocation4], 1 }
 0x4b3   :  { %2013 = vsyncpa [#allocation7], 1 }
 0x4b4   :  { %2014 = vsyncpa [#allocation10], 1 }
 0x4b5   :  { %2015 = vsyncpa [#allocation5], 1 }

</bundles_post_ra>
